<compile_context>
chip_gen: v5e
topology: v5e:2x2
jax: 0.10.0
libtpu: 0.0.40
codegen_flags: <defaults>
</compile_context>

<pallas_src>
import math
import functools
from types import SimpleNamespace

import jax
import jax.numpy as jnp
from jax.experimental import pallas as pl
from jax.experimental.pallas import tpu as pltpu

# ----------------------------- model dimensions -----------------------------
HIDDEN = 64
NUM_HEADS = 4
HEAD_DIM = HIDDEN // NUM_HEADS
INTERMEDIATE = 128
VOCAB = 100
MAX_TXT_LEN = 16
MAX_ACTION_STEPS = 20
IMG_FEAT_DIM = 32
ANG_FEAT_DIM = 8
NUM_L_LAYERS = 2
NUM_X_LAYERS = 2
NUM_PANO = 6

SEQ_BUCKET = 8          # pad sequence dims to multiples of 8 (sublane granule)
NEG_MASK = -1e9         # finite large-negative => downstream softmax is NaN-safe

_VMEM = pl.BlockSpec(memory_space=pltpu.MemorySpace.VMEM)


def _round_up(n, m):
    return ((n + m - 1) // m) * m


def _pad_axis(x, target, axis):
    pad = target - x.shape[axis]
    if pad <= 0:
        return x
    widths = [(0, 0)] * x.ndim
    widths[axis] = (0, pad)
    return jnp.pad(x, widths)


# --------------------------- in-kernel building blocks ------------------------
def _ln_f(x, g, b):
    x = x.astype(jnp.float32)
    mu = jnp.mean(x, axis=-1, keepdims=True)
    xc = x - mu
    var = jnp.mean(xc * xc, axis=-1, keepdims=True)
    return xc * jax.lax.rsqrt(var + 1e-12) * g + b


def _lin(x, w, b):
    """y = x @ w + b.  w stored bf16 (MXU operand); math/output stay f32."""
    lead = x.shape[:-1]
    x2 = x.reshape(-1, x.shape[-1]).astype(jnp.bfloat16)
    y = jnp.dot(x2, w, preferred_element_type=jnp.float32) + b
    return y.reshape(lead + (w.shape[-1],))


def _attn_core(q, k, v, kv_mask):
    """q:[B,Lq,H], k/v:[B,Lk,H], kv_mask:[B,Lk] in {0,1} -> [B,Lq,H] (f32)."""
    bias = (kv_mask - 1.0)[:, None, :] * 1e9        # 0 for valid, -1e9 invalid
    scale = 1.0 / math.sqrt(HEAD_DIM)
    ctx = []
    for h in range(NUM_HEADS):
        sl = slice(h * HEAD_DIM, (h + 1) * HEAD_DIM)
        s = jnp.einsum('bqd,bkd->bqk', q[..., sl] * scale, k[..., sl],
                       preferred_element_type=jnp.float32) + bias
        s = s - jnp.max(s, axis=-1, keepdims=True)
        p = jnp.exp(s)
        p = p * pl.reciprocal(jnp.sum(p, axis=-1, keepdims=True), approx=True)
        ctx.append(jnp.einsum('bqk,bkd->bqd', p, v[..., sl],
                              preferred_element_type=jnp.float32))
    return jnp.concatenate(ctx, axis=-1)


def _mha_self(x, mask, wqkv, bqkv, wo, bo, g, b):
    qkv = _lin(x, wqkv, bqkv)                       # fused QKV projection
    q = qkv[..., :HIDDEN]
    k = qkv[..., HIDDEN:2 * HIDDEN]
    v = qkv[..., 2 * HIDDEN:]
    ctx = _attn_core(q, k, v, mask)
    return _ln_f(_lin(ctx, wo, bo) + x, g, b)


def _mha_cross(xq, xkv, kv_mask, wq, bq, wkv, bkv, wo, bo, g, b):
    q = _lin(xq, wq, bq)
    kv = _lin(xkv, wkv, bkv)                        # fused KV projection
    ctx = _attn_core(q, kv[..., :HIDDEN], kv[..., HIDDEN:], kv_mask)
    return _ln_f(_lin(ctx, wo, bo) + xq, g, b)


def _ffn(x, w1, b1, w2, b2, g, b):
    h = jax.nn.gelu(_lin(x, w1, b1))
    return _ln_f(_lin(h, w2, b2) + x, g, b)


# ----------------------------- fused mode kernels -----------------------------
def _lang_kernel(emb_ref, mask_ref, e_g, e_b,
                 wqkv, bqkv, wo, bo, a_g, a_b,
                 w1, b1, w2, b2, f_g, f_b,
                 o_ref):
    x = _ln_f(emb_ref[...], e_g[...], e_b[...])
    mask = mask_ref[...]
    for l in range(NUM_L_LAYERS):
        x = _mha_self(x, mask, wqkv[l], bqkv[l], wo[l], bo[l], a_g[l], a_b[l])
        x = _ffn(x, w1[l], b1[l], w2[l], b2[l], f_g[l], f_b[l])
    o_ref[...] = x


def _hist0_kernel(step_ref, cls_ref, typ_ref, g_ref, b_ref, o_ref):
    e = _ln_f(cls_ref[...] + step_ref[...] + typ_ref[...], g_ref[...], b_ref[...])
    o_ref[...] = jnp.broadcast_to(e, o_ref.shape)


def _hist1_kernel(img_ref, ang_ref, pimg_ref, pang_ref, step_ref,
                  i_w, i_b, i_g, i_bt,
                  a_w, a_b, a_g, a_bt,
                  pi_w, pi_b, pa_w, pa_b, p_g, p_bt,
                  cls_ref, typ_ref, g_ref, bt_ref, o_ref):
    B = img_ref.shape[0]
    img_e = _ln_f(_lin(img_ref[...], i_w[...], i_b[...]), i_g[...], i_bt[...])
    ang_e = _ln_f(_lin(ang_ref[...], a_w[...], a_b[...]), a_g[...], a_bt[...])
    pano = _ln_f(_lin(pimg_ref[...], pi_w[...], pi_b[...])
                 + _lin(pang_ref[...], pa_w[...], pa_b[...]),
                 p_g[...], p_bt[...])
    pano = jnp.mean(pano, axis=1)                           # [B, H] pano agg.
    feat = (img_e + ang_e + pano)[:, None, :]               # [B, 1, H]
    step = step_ref[...]                                    # [1, 2, H]
    typ = typ_ref[...]                                      # [1, 1, H]
    g = g_ref[...]
    bt = bt_ref[...]
    # TODO(synk): exact per-step recurrence of the causal history encoder is not
    # in the provided source; a cls token is prepended so one embedding is
    # produced per hist_step_id.
    row0 = _ln_f(cls_ref[...] + step[:, 0:1] + typ, g, bt)  # [1, 1, H]
    o_ref[:, 0:1, :] = jnp.broadcast_to(row0, (B, 1, HIDDEN))
    o_ref[:, 1:2, :] = _ln_f(feat + step[:, 1:2] + typ, g, bt)


def _visual_kernel(txt_ref, txt_mask_ref,
                   ob_img_ref, ob_ang_ref, ob_type_ref, ob_mask_ref,
                   hist_ref, hist_mask_ref, prefix_ref, prefix_mask_ref,
                   valid_ref,
                   oi_w, oi_b, oi_g, oi_bt, oa_w, oa_b, oa_g, oa_bt, o_g, o_bt,
                   c_wq, c_bq, c_wkv, c_bkv, c_wo, c_bo, c_g, c_b,
                   s_wq, s_bq, s_wkv, s_bkv, s_wo, s_bo, s_g, s_b,
                   f_w1, f_b1, f_w2, f_b2, f_g, f_b,
                   act_w, act_b,
                   logits_ref, hist_out_ref, states_ref):
    txt = txt_ref[...]
    txt_mask = txt_mask_ref[...]

    ob_e = (_ln_f(_lin(ob_img_ref[...], oi_w[...], oi_b[...]), oi_g[...], oi_bt[...])
            + _ln_f(_lin(ob_ang_ref[...], oa_w[...], oa_b[...]), oa_g[...], oa_bt[...])
            + ob_type_ref[...])
    ob_e = _ln_f(ob_e, o_g[...], o_bt[...])

    nh = hist_ref.shape[1]
    x = jnp.concatenate([hist_ref[...], ob_e], axis=1)
    x_mask = jnp.concatenate([hist_mask_ref[...], ob_mask_ref[...]], axis=1)
    prefix = prefix_ref[...]
    prefix_mask = prefix_mask_ref[...]

    for l in range(NUM_X_LAYERS):
        x = _mha_cross(x, txt, txt_mask,
                       c_wq[l], c_bq[l], c_wkv[l], c_bkv[l],
                       c_wo[l], c_bo[l], c_g[l], c_b[l])
        kv = jnp.concatenate([prefix, x], axis=1)           # causal prefix
        kv_mask = jnp.concatenate([prefix_mask, x_mask], axis=1)
        x = _mha_cross(x, kv, kv_mask,
                       s_wq[l], s_bq[l], s_wkv[l], s_bkv[l],
                       s_wo[l], s_bo[l], s_g[l], s_b[l])
        x = _ffn(x, f_w1[l], f_b1[l], f_w2[l], f_b2[l], f_g[l], f_b[l])

    hist_hidden = x[:, :nh]
    ob_hidden = x[:, nh:]
    states = hist_hidden[:, 0] * txt[:, 0]                  # [B, H]
    fused = ob_hidden * states[:, None, :]                  # [B, No, H]
    logits = jnp.sum(fused * act_w[...], axis=-1) + act_b[...]
    logits = jnp.where(valid_ref[...] > 0.5, logits, NEG_MASK)

    logits_ref[...] = logits
    hist_out_ref[...] = hist_hidden
    states_ref[...] = states


# ----------------------------- parameter setup -------------------------------
class _KeyGen:
    def __init__(self, seed):
        self._key = jax.random.PRNGKey(seed)

    def __call__(self):
        self._key, sub = jax.random.split(self._key)
        return sub


def _w(kg, shape):
    # matmul weights stored bf16 (MXU operands); everything else stays f32
    return (jax.random.normal(kg(), shape, jnp.float32) * 0.02).astype(jnp.bfloat16)


def _zeros(shape):
    return jnp.zeros(shape, jnp.float32)


def _ones(shape):
    return jnp.ones(shape, jnp.float32)


def init_vlnbert_params(seed=0):
    kg = _KeyGen(seed)
    emb = lambda n: jax.random.normal(kg(), (n, HIDDEN), jnp.float32) * 0.02
    NL, NX, H, I = NUM_L_LAYERS, NUM_X_LAYERS, HIDDEN, INTERMEDIATE

    lang = dict(
        word_emb=emb(VOCAB), pos_emb=emb(MAX_TXT_LEN), type_emb=emb(2),
        emb_ln_g=_ones((1, H)), emb_ln_b=_zeros((1, H)),
        wqkv=_w(kg, (NL, H, 3 * H)), bqkv=_zeros((NL, 1, 3 * H)),
        wo=_w(kg, (NL, H, H)), bo=_zeros((NL, 1, H)),
        attn_ln_g=_ones((NL, 1, H)), attn_ln_b=_zeros((NL, 1, H)),
        w1=_w(kg, (NL, H, I)), b1=_zeros((NL, 1, I)),
        w2=_w(kg, (NL, I, H)), b2=_zeros((NL, 1, H)),
        ffn_ln_g=_ones((NL, 1, H)), ffn_ln_b=_zeros((NL, 1, H)),
    )

    hist = dict(
        cls_token=_zeros((1, 1, H)),
        step_emb=emb(MAX_ACTION_STEPS),
        type_emb=emb(1).reshape(1, 1, H),
        img_w=_w(kg, (IMG_FEAT_DIM, H)), img_b=_zeros((1, H)),
        img_ln_g=_ones((1, H)), img_ln_b=_zeros((1, H)),
        ang_w=_w(kg, (ANG_FEAT_DIM, H)), ang_b=_zeros((1, H)),
        ang_ln_g=_ones((1, H)), ang_ln_b=_zeros((1, H)),
        pimg_w=_w(kg, (IMG_FEAT_DIM, H)), pimg_b=_zeros((1, H)),
        pang_w=_w(kg, (ANG_FEAT_DIM, H)), pang_b=_zeros((1, H)),
        pano_ln_g=_ones((1, H)), pano_ln_b=_zeros((1, H)),
        ln_g=_ones((1, H)), ln_b=_zeros((1, H)),
    )

    vis = dict(
        nav_type_emb=emb(3), ob_type_emb=emb(1),
        ob_img_w=_w(kg, (IMG_FEAT_DIM, H)), ob_img_b=_zeros((1, H)),
        ob_img_ln_g=_ones((1, H)), ob_img_ln_b=_zeros((1, H)),
        ob_ang_w=_w(kg, (ANG_FEAT_DIM, H)), ob_ang_b=_zeros((1, H)),
        ob_ang_ln_g=_ones((1, H)), ob_ang_ln_b=_zeros((1, H)),
        ob_ln_g=_ones((1, H)), ob_ln_b=_zeros((1, H)),
        c_wq=_w(kg, (NX, H, H)), c_bq=_zeros((NX, 1, H)),
        c_wkv=_w(kg, (NX, H, 2 * H)), c_bkv=_zeros((NX, 1, 2 * H)),
        c_wo=_w(kg, (NX, H, H)), c_bo=_zeros((NX, 1, H)),
        c_ln_g=_ones((NX, 1, H)), c_ln_b=_zeros((NX, 1, H)),
        s_wq=_w(kg, (NX, H, H)), s_bq=_zeros((NX, 1, H)),
        s_wkv=_w(kg, (NX, H, 2 * H)), s_bkv=_zeros((NX, 1, 2 * H)),
        s_wo=_w(kg, (NX, H, H)), s_bo=_zeros((NX, 1, H)),
        s_ln_g=_ones((NX, 1, H)), s_ln_b=_zeros((NX, 1, H)),
        f_w1=_w(kg, (NX, H, I)), f_b1=_zeros((NX, 1, I)),
        f_w2=_w(kg, (NX, I, H)), f_b2=_zeros((NX, 1, H)),
        f_ln_g=_ones((NX, 1, H)), f_ln_b=_zeros((NX, 1, H)),
        act_w=jax.random.normal(kg(), (1, 1, H), jnp.float32) * 0.02,
        act_b=_zeros((1, 1)),
    )
    return dict(lang=lang, hist=hist, visual=vis)


# ------------------------------ mode dispatchers ------------------------------
def _language_impl(p, txt_ids, txt_mask):
    B, L = txt_ids.shape
    emb = (p["word_emb"][txt_ids]
           + p["pos_emb"][:L][None]
           + p["type_emb"][0][None, None])
    args = (emb, txt_mask,
            p["emb_ln_g"], p["emb_ln_b"],
            p["wqkv"], p["bqkv"], p["wo"], p["bo"],
            p["attn_ln_g"], p["attn_ln_b"],
            p["w1"], p["b1"], p["w2"], p["b2"],
            p["ffn_ln_g"], p["ffn_ln_b"])
    return pl.pallas_call(
        _lang_kernel,
        out_shape=jax.ShapeDtypeStruct((B, L, HIDDEN), jnp.float32),
        in_specs=[_VMEM] * len(args),
        out_specs=_VMEM,
    )(*args)


def _hist0_impl(p, step_e, batch_size):
    args = (step_e, p["cls_token"], p["type_emb"], p["ln_g"], p["ln_b"])
    return pl.pallas_call(
        _hist0_kernel,
        out_shape=jax.ShapeDtypeStruct((batch_size, 1, HIDDEN), jnp.float32),
        in_specs=[_VMEM] * len(args),
        out_specs=_VMEM,
    )(*args)


def _hist1_impl(p, img, ang, pimg, pang, step_e):
    B = img.shape[0]
    args = (img, ang, pimg, pang, step_e,
            p["img_w"], p["img_b"], p["img_ln_g"], p["img_ln_b"],
            p["ang_w"], p["ang_b"], p["ang_ln_g"], p["ang_ln_b"],
            p["pimg_w"], p["pimg_b"], p["pang_w"], p["pang_b"],
            p["pano_ln_g"], p["pano_ln_b"],
            p["cls_token"], p["type_emb"], p["ln_g"], p["ln_b"])
    return pl.pallas_call(
        _hist1_kernel,
        out_shape=jax.ShapeDtypeStruct((B, 2, HIDDEN), jnp.float32),
        in_specs=[_VMEM] * len(args),
        out_specs=_VMEM,
    )(*args)


def _visual_impl(p, txt, txt_mask, ob_img, ob_ang, ob_nav, ob_mask,
                 hist, hist_mask, prefix, prefix_mask):
    ob_type = p["nav_type_emb"][ob_nav] + p["ob_type_emb"][0]      # XLA gather glue
    valid = ((ob_nav != 0) & (ob_mask > 0.5)).astype(jnp.float32)
    B, nh = hist.shape[0], hist.shape[1]
    no = ob_img.shape[1]
    args = (txt, txt_mask, ob_img, ob_ang, ob_type, ob_mask,
            hist, hist_mask, prefix, prefix_mask, valid,
            p["ob_img_w"], p["ob_img_b"], p["ob_img_ln_g"], p["ob_img_ln_b"],
            p["ob_ang_w"], p["ob_ang_b"], p["ob_ang_ln_g"], p["ob_ang_ln_b"],
            p["ob_ln_g"], p["ob_ln_b"],
            p["c_wq"], p["c_bq"], p["c_wkv"], p["c_bkv"], p["c_wo"], p["c_bo"],
            p["c_ln_g"], p["c_ln_b"],
            p["s_wq"], p["s_bq"], p["s_wkv"], p["s_bkv"], p["s_wo"], p["s_bo"],
            p["s_ln_g"], p["s_ln_b"],
            p["f_w1"], p["f_b1"], p["f_w2"], p["f_b2"], p["f_ln_g"], p["f_ln_b"],
            p["act_w"], p["act_b"])
    out_shapes = (jax.ShapeDtypeStruct((B, no), jnp.float32),
                  jax.ShapeDtypeStruct((B, nh, HIDDEN), jnp.float32),
                  jax.ShapeDtypeStruct((B, HIDDEN), jnp.float32))
    return pl.pallas_call(
        _visual_kernel,
        out_shape=out_shapes,
        in_specs=[_VMEM] * len(args),
        out_specs=(_VMEM, _VMEM, _VMEM),
    )(*args)


# ------------------------------ VLNBertCausalCMT -----------------------------
class VLNBertCausalCMT:
    def __init__(self, args):
        self.args = args
        self.params = init_vlnbert_params(seed=0)
        self._lang_fn = jax.jit(functools.partial(_language_impl, self.params["lang"]))
        self._visual_fn = jax.jit(functools.partial(_visual_impl, self.params["visual"]))

    # nn.Dropout(p=args.feat_dropout) in eval mode -> identity (deterministic).
    def drop_env(self, x):
        return x

    def __call__(self, mode, txt_ids=None, txt_masks=None, txt_embeds=None,
                 hist_img_feats=None, hist_ang_feats=None,
                 hist_pano_img_feats=None, hist_pano_ang_feats=None, ob_step=0,
                 new_hist_embeds=None, new_hist_masks=None, prefix_hiddens=None,
                 prefix_masks=None, ob_img_feats=None, ob_ang_feats=None,
                 ob_nav_types=None, ob_masks=None, return_states=False,
                 batch_size=None):
        if mode == "language":
            B, L = txt_ids.shape
            Lp = _round_up(L, SEQ_BUCKET)
            ids = _pad_axis(txt_ids.astype(jnp.int32), Lp, 1)
            mask = _pad_axis(txt_masks.astype(jnp.float32), Lp, 1)
            out = self._lang_fn(ids, mask)
            return out[:, :L]

        elif mode == "history":
            p = self.params["hist"]
            if ob_step == 0:
                hist_step_ids = jnp.arange(1, dtype=jnp.int32)
            else:
                hist_step_ids = jnp.arange(2, dtype=jnp.int32) + ob_step - 1
            hist_step_ids = hist_step_ids[None]
            step_e = p["step_emb"][hist_step_ids[0]][None]        # [1, n, H]
            if hist_img_feats is not None:
                hist_img_feats = self.drop_env(hist_img_feats)
            if hist_pano_img_feats is not None:
                hist_pano_img_feats = self.drop_env(hist_pano_img_feats)
            if hist_img_feats is None:
                return _hist0_impl(p, step_e, batch_size)
            return _hist1_impl(p,
                               hist_img_feats.astype(jnp.float32),
                               hist_ang_feats.astype(jnp.float32),
                               hist_pano_img_feats.astype(jnp.float32),
                               hist_pano_ang_feats.astype(jnp.float32),
                               step_e)

        elif mode == "visual":
            ob_img_feats = self.drop_env(ob_img_feats)
            B, L = txt_masks.shape
            No = ob_img_feats.shape[1]
            Nh = new_hist_embeds.shape[1]
            Lp = _round_up(L, SEQ_BUCKET)
            Nop = _round_up(No, SEQ_BUCKET)
            Nhp = _round_up(Nh, SEQ_BUCKET)
            if prefix_hiddens is None:
                Npf = SEQ_BUCKET
                prefix = jnp.zeros((B, Npf, HIDDEN), jnp.float32)
                prefix_mask = jnp.zeros((B, Npf), jnp.float32)
            else:
                Npf = _round_up(prefix_hiddens.shape[1], SEQ_BUCKET)
                prefix = _pad_axis(prefix_hiddens.astype(jnp.float32), Npf, 1)
                prefix_mask = _pad_axis(prefix_masks.astype(jnp.float32), Npf, 1)

            txt = _pad_axis(txt_embeds.astype(jnp.float32), Lp, 1)
            txt_mask = _pad_axis(txt_masks.astype(jnp.float32), Lp, 1)
            ob_img = _pad_axis(ob_img_feats.astype(jnp.float32), Nop, 1)
            ob_ang = _pad_axis(ob_ang_feats.astype(jnp.float32), Nop, 1)
            ob_nav = _pad_axis(ob_nav_types.astype(jnp.int32), Nop, 1)
            ob_mask = _pad_axis(ob_masks.astype(jnp.float32), Nop, 1)
            hist = _pad_axis(new_hist_embeds.astype(jnp.float32), Nhp, 1)
            hist_mask = _pad_axis(new_hist_masks.astype(jnp.float32), Nhp, 1)

            act_logits, hist_hidden, states = self._visual_fn(
                txt, txt_mask, ob_img, ob_ang, ob_nav, ob_mask,
                hist, hist_mask, prefix, prefix_mask)

            act_logits = act_logits[:, :No]
            # TODO(synk): real model caches per-layer prefix hiddens; we return
            # the final-layer history hiddens as the causal prefix instead.
            new_prefix_hiddens = hist_hidden[:, :Nh]
            if return_states:
                return act_logits, new_prefix_hiddens, states
            return act_logits, new_prefix_hiddens
        else:
            raise NotImplementedError(mode)


# ----------------------------------- demo ------------------------------------
if __name__ == "__main__":
    B, L, NO = 2, 8, 8
    args = SimpleNamespace(feat_dropout=0.4)
    model = VLNBertCausalCMT(args)

    key = jax.random.PRNGKey(0)
    ks = jax.random.split(key, 8)

    txt_ids = jax.random.randint(ks[0], (B, L), 0, VOCAB)
    txt_masks = jnp.ones((B, L), jnp.float32).at[1, 6:].set(0.0)

    # mode == 'language'
    txt_embeds = model("language", txt_ids=txt_ids, txt_masks=txt_masks)

    # mode == 'history', step 0 (no features yet)
    hist0 = model("history", ob_step=0, batch_size=B)

    # mode == 'history', step 1 (with features)
    hist_img_feats = jax.random.normal(ks[1], (B, IMG_FEAT_DIM), jnp.float32)
    hist_ang_feats = jax.random.normal(ks[2], (B, ANG_FEAT_DIM), jnp.float32)
    hist_pano_img = jax.random.normal(ks[3], (B, NUM_PANO, IMG_FEAT_DIM), jnp.float32)
    hist_pano_ang = jax.random.normal(ks[4], (B, NUM_PANO, ANG_FEAT_DIM), jnp.float32)
    hist1 = model("history", hist_img_feats=hist_img_feats,
                  hist_ang_feats=hist_ang_feats,
                  hist_pano_img_feats=hist_pano_img,
                  hist_pano_ang_feats=hist_pano_ang, ob_step=1)

    new_hist_embeds = jnp.concatenate([hist0, hist1], axis=1)     # [B, 3, H]
    new_hist_masks = jnp.ones((B, new_hist_embeds.shape[1]), bool)

    # mode == 'visual'
    ob_img_feats = jax.random.normal(ks[5], (B, NO, IMG_FEAT_DIM), jnp.float32)
    ob_ang_feats = jax.random.normal(ks[6], (B, NO, ANG_FEAT_DIM), jnp.float32)
    ob_masks = jnp.ones((B, NO), bool).at[1, 6:].set(False)
    ob_nav_types = jnp.where(
        ob_masks,
        jnp.concatenate([jnp.ones((B, NO - 1), jnp.int32),
                         jnp.full((B, 1), 2, jnp.int32)], axis=1),
        0)

    act_logits, prefix_hiddens, states = model(
        "visual", txt_embeds=txt_embeds, txt_masks=txt_masks,
        ob_img_feats=ob_img_feats, ob_ang_feats=ob_ang_feats,
        ob_nav_types=ob_nav_types, ob_masks=ob_masks,
        new_hist_embeds=new_hist_embeds, new_hist_masks=new_hist_masks,
        prefix_hiddens=None, prefix_masks=None, return_states=True)

    # second visual step with a causal prefix (same bucketed shapes -> no recompile)
    prefix_masks = jnp.ones((B, prefix_hiddens.shape[1]), bool)
    act_logits2, prefix_hiddens2 = model(
        "visual", txt_embeds=txt_embeds, txt_masks=txt_masks,
        ob_img_feats=ob_img_feats, ob_ang_feats=ob_ang_feats,
        ob_nav_types=ob_nav_types, ob_masks=ob_masks,
        new_hist_embeds=new_hist_embeds, new_hist_masks=new_hist_masks,
        prefix_hiddens=prefix_hiddens, prefix_masks=prefix_masks,
        return_states=False)

    jax.block_until_ready((txt_embeds, hist0, hist1, act_logits,
                           prefix_hiddens, states, act_logits2,
                           prefix_hiddens2))
    print("KERNEL_OK")
</pallas_src>

<mosaic_0001>
module attributes {stable_mosaic.version = 11 : i64} {
  func.func @_lang_kernel(%arg0: memref<2x8x64xf32, #tpu.memory_space<vmem>>, %arg1: memref<2x8xf32, #tpu.memory_space<vmem>>, %arg2: memref<1x64xf32, #tpu.memory_space<vmem>>, %arg3: memref<1x64xf32, #tpu.memory_space<vmem>>, %arg4: memref<2x64x192xbf16, #tpu.memory_space<vmem>>, %arg5: memref<2x1x192xf32, #tpu.memory_space<vmem>>, %arg6: memref<2x64x64xbf16, #tpu.memory_space<vmem>>, %arg7: memref<2x1x64xf32, #tpu.memory_space<vmem>>, %arg8: memref<2x1x64xf32, #tpu.memory_space<vmem>>, %arg9: memref<2x1x64xf32, #tpu.memory_space<vmem>>, %arg10: memref<2x64x128xbf16, #tpu.memory_space<vmem>>, %arg11: memref<2x1x128xf32, #tpu.memory_space<vmem>>, %arg12: memref<2x128x64xbf16, #tpu.memory_space<vmem>>, %arg13: memref<2x1x64xf32, #tpu.memory_space<vmem>>, %arg14: memref<2x1x64xf32, #tpu.memory_space<vmem>>, %arg15: memref<2x1x64xf32, #tpu.memory_space<vmem>>, %arg16: memref<2x8x64xf32, #tpu.memory_space<vmem>>) attributes {dimension_semantics = [], scalar_prefetch = 0 : i64, scratch_operands = 0 : i64, tpu.core_type = #tpu.core_type<tc>} {
    %c0 = arith.constant 0 : index
    %c0_0 = arith.constant 0 : index
    %c0_1 = arith.constant 0 : index
    %0 = vector.load %arg0[%c0, %c0_0, %c0_1] : memref<2x8x64xf32, #tpu.memory_space<vmem>>, vector<2x8x64xf32>
    %c0_2 = arith.constant 0 : index
    %c0_3 = arith.constant 0 : index
    %1 = vector.load %arg2[%c0_2, %c0_3] : memref<1x64xf32, #tpu.memory_space<vmem>>, vector<1x64xf32>
    %c0_4 = arith.constant 0 : index
    %c0_5 = arith.constant 0 : index
    %2 = vector.load %arg3[%c0_4, %c0_5] : memref<1x64xf32, #tpu.memory_space<vmem>>, vector<1x64xf32>
    %cst = arith.constant dense<0.000000e+00> : vector<2x8xf32>
    %3 = vector.multi_reduction <add>, %0, %cst [2] : vector<2x8x64xf32> to vector<2x8xf32>
    %4 = vector.shape_cast %3 : vector<2x8xf32> to vector<2x8x1xf32>
    %cst_6 = arith.constant 6.400000e+01 : f32
    %5 = vector.broadcast %cst_6 : f32 to vector<2x8x1xf32>
    %6 = arith.divf %4, %5 : vector<2x8x1xf32>
    %7 = vector.broadcast %6 : vector<2x8x1xf32> to vector<2x8x64xf32>
    %8 = arith.subf %0, %7 : vector<2x8x64xf32>
    %9 = arith.mulf %8, %8 : vector<2x8x64xf32>
    %cst_7 = arith.constant dense<0.000000e+00> : vector<2x8xf32>
    %10 = vector.multi_reduction <add>, %9, %cst_7 [2] : vector<2x8x64xf32> to vector<2x8xf32>
    %11 = vector.shape_cast %10 : vector<2x8xf32> to vector<2x8x1xf32>
    %cst_8 = arith.constant 6.400000e+01 : f32
    %12 = vector.broadcast %cst_8 : f32 to vector<2x8x1xf32>
    %13 = arith.divf %11, %12 : vector<2x8x1xf32>
    %cst_9 = arith.constant 9.99999996E-13 : f32
    %14 = vector.broadcast %cst_9 : f32 to vector<2x8x1xf32>
    %15 = arith.addf %13, %14 : vector<2x8x1xf32>
    %16 = math.rsqrt %15 : vector<2x8x1xf32>
    %17 = vector.broadcast %16 : vector<2x8x1xf32> to vector<2x8x64xf32>
    %18 = arith.mulf %8, %17 : vector<2x8x64xf32>
    %19 = vector.shape_cast %1 : vector<1x64xf32> to vector<1x1x64xf32>
    %20 = vector.broadcast %19 : vector<1x1x64xf32> to vector<2x8x64xf32>
    %21 = arith.mulf %18, %20 : vector<2x8x64xf32>
    %22 = vector.shape_cast %2 : vector<1x64xf32> to vector<1x1x64xf32>
    %23 = vector.broadcast %22 : vector<1x1x64xf32> to vector<2x8x64xf32>
    %24 = arith.addf %21, %23 : vector<2x8x64xf32>
    %c0_10 = arith.constant 0 : index
    %c0_11 = arith.constant 0 : index
    %25 = vector.load %arg1[%c0_10, %c0_11] : memref<2x8xf32, #tpu.memory_space<vmem>>, vector<2x8xf32>
    %c0_12 = arith.constant 0 : index
    %c0_13 = arith.constant 0 : index
    %c0_14 = arith.constant 0 : index
    %26 = vector.load %arg4[%c0_12, %c0_13, %c0_14] : memref<2x64x192xbf16, #tpu.memory_space<vmem>>, vector<1x64x192xbf16>
    %27 = vector.shape_cast %26 : vector<1x64x192xbf16> to vector<64x192xbf16>
    %c0_15 = arith.constant 0 : index
    %c0_16 = arith.constant 0 : index
    %c0_17 = arith.constant 0 : index
    %28 = vector.load %arg5[%c0_15, %c0_16, %c0_17] : memref<2x1x192xf32, #tpu.memory_space<vmem>>, vector<1x1x192xf32>
    %29 = vector.shape_cast %28 : vector<1x1x192xf32> to vector<1x192xf32>
    %c0_18 = arith.constant 0 : index
    %c0_19 = arith.constant 0 : index
    %c0_20 = arith.constant 0 : index
    %30 = vector.load %arg6[%c0_18, %c0_19, %c0_20] : memref<2x64x64xbf16, #tpu.memory_space<vmem>>, vector<1x64x64xbf16>
    %31 = vector.shape_cast %30 : vector<1x64x64xbf16> to vector<64x64xbf16>
    %c0_21 = arith.constant 0 : index
    %c0_22 = arith.constant 0 : index
    %c0_23 = arith.constant 0 : index
    %32 = vector.load %arg7[%c0_21, %c0_22, %c0_23] : memref<2x1x64xf32, #tpu.memory_space<vmem>>, vector<1x1x64xf32>
    %33 = vector.shape_cast %32 : vector<1x1x64xf32> to vector<1x64xf32>
    %c0_24 = arith.constant 0 : index
    %c0_25 = arith.constant 0 : index
    %c0_26 = arith.constant 0 : index
    %34 = vector.load %arg8[%c0_24, %c0_25, %c0_26] : memref<2x1x64xf32, #tpu.memory_space<vmem>>, vector<1x1x64xf32>
    %35 = vector.shape_cast %34 : vector<1x1x64xf32> to vector<1x64xf32>
    %c0_27 = arith.constant 0 : index
    %c0_28 = arith.constant 0 : index
    %c0_29 = arith.constant 0 : index
    %36 = vector.load %arg9[%c0_27, %c0_28, %c0_29] : memref<2x1x64xf32, #tpu.memory_space<vmem>>, vector<1x1x64xf32>
    %37 = vector.shape_cast %36 : vector<1x1x64xf32> to vector<1x64xf32>
    %38 = vector.shape_cast %24 : vector<2x8x64xf32> to vector<16x64xf32>
    %39 = arith.truncf %38 : vector<16x64xf32> to vector<16x64xbf16>
    %cst_30 = arith.constant dense<0.000000e+00> : vector<16x192xf32>
    %40 = tpu.matmul %39, %27, %cst_30 {dimension_numbers = #tpu.dot_dimension_numbers<[1], [0], [0], [1], [0, 0, 1, 1], [], []>} : vector<16x64xbf16>, vector<64x192xbf16>, vector<16x192xf32> -> vector<16x192xf32>
    %41 = vector.broadcast %29 : vector<1x192xf32> to vector<16x192xf32>
    %42 = arith.addf %40, %41 : vector<16x192xf32>
    %43 = vector.shape_cast %42 : vector<16x192xf32> to vector<2x8x192xf32>
    %44 = vector.extract_strided_slice %43 {offsets = [0, 0, 0], sizes = [2, 8, 64], strides = [1, 1, 1]} : vector<2x8x192xf32> to vector<2x8x64xf32>
    %45 = vector.extract_strided_slice %43 {offsets = [0, 0, 64], sizes = [2, 8, 64], strides = [1, 1, 1]} : vector<2x8x192xf32> to vector<2x8x64xf32>
    %46 = vector.extract_strided_slice %43 {offsets = [0, 0, 128], sizes = [2, 8, 64], strides = [1, 1, 1]} : vector<2x8x192xf32> to vector<2x8x64xf32>
    %cst_31 = arith.constant 1.000000e+00 : f32
    %47 = vector.broadcast %cst_31 : f32 to vector<2x8xf32>
    %48 = arith.subf %25, %47 : vector<2x8xf32>
    %49 = vector.shape_cast %48 : vector<2x8xf32> to vector<2x1x8xf32>
    %cst_32 = arith.constant 1.000000e+09 : f32
    %50 = vector.broadcast %cst_32 : f32 to vector<2x1x8xf32>
    %51 = arith.mulf %49, %50 : vector<2x1x8xf32>
    %52 = vector.extract_strided_slice %44 {offsets = [0, 0, 0], sizes = [2, 8, 16], strides = [1, 1, 1]} : vector<2x8x64xf32> to vector<2x8x16xf32>
    %cst_33 = arith.constant 2.500000e-01 : f32
    %53 = vector.broadcast %cst_33 : f32 to vector<2x8x16xf32>
    %54 = arith.mulf %52, %53 : vector<2x8x16xf32>
    %55 = vector.extract_strided_slice %45 {offsets = [0, 0, 0], sizes = [2, 8, 16], strides = [1, 1, 1]} : vector<2x8x64xf32> to vector<2x8x16xf32>
    "tpu.trace_start"() <{level = 10 : i32, message = "bqd,bkd->bqk"}> : () -> ()
    %cst_34 = arith.constant dense<0.000000e+00> : vector<2x8x8xf32>
    %56 = tpu.matmul %54, %55, %cst_34 {dimension_numbers = #tpu.dot_dimension_numbers<[2], [2], [1], [1], [0, 0, 0, 1, 1, 1], [0], [0]>} : vector<2x8x16xf32>, vector<2x8x16xf32>, vector<2x8x8xf32> -> vector<2x8x8xf32>
    "tpu.trace_stop"() : () -> ()
    %57 = vector.broadcast %51 : vector<2x1x8xf32> to vector<2x8x8xf32>
    %58 = arith.addf %56, %57 : vector<2x8x8xf32>
    %cst_35 = arith.constant dense<0xFF800000> : vector<2x8xf32>
    %59 = vector.multi_reduction <maximumf>, %58, %cst_35 [2] : vector<2x8x8xf32> to vector<2x8xf32>
    %60 = vector.shape_cast %59 : vector<2x8xf32> to vector<2x8x1xf32>
    %61 = vector.broadcast %60 : vector<2x8x1xf32> to vector<2x8x8xf32>
    %62 = arith.subf %58, %61 : vector<2x8x8xf32>
    %63 = math.exp %62 : vector<2x8x8xf32>
    %cst_36 = arith.constant dense<0.000000e+00> : vector<2x8xf32>
    %64 = vector.multi_reduction <add>, %63, %cst_36 [2] : vector<2x8x8xf32> to vector<2x8xf32>
    %65 = vector.shape_cast %64 : vector<2x8xf32> to vector<2x8x1xf32>
    %66 = tpu.reciprocal %65 {approx = true} : vector<2x8x1xf32> -> vector<2x8x1xf32>
    %67 = vector.broadcast %66 : vector<2x8x1xf32> to vector<2x8x8xf32>
    %68 = arith.mulf %63, %67 : vector<2x8x8xf32>
    %69 = vector.extract_strided_slice %46 {offsets = [0, 0, 0], sizes = [2, 8, 16], strides = [1, 1, 1]} : vector<2x8x64xf32> to vector<2x8x16xf32>
    "tpu.trace_start"() <{level = 10 : i32, message = "bqk,bkd->bqd"}> : () -> ()
    %cst_37 = arith.constant dense<0.000000e+00> : vector<2x8x16xf32>
    %70 = tpu.matmul %68, %69, %cst_37 {dimension_numbers = #tpu.dot_dimension_numbers<[2], [1], [1], [2], [0, 0, 0, 1, 1, 2], [0], [0]>} : vector<2x8x8xf32>, vector<2x8x16xf32>, vector<2x8x16xf32> -> vector<2x8x16xf32>
    "tpu.trace_stop"() : () -> ()
    %71 = vector.extract_strided_slice %44 {offsets = [0, 0, 16], sizes = [2, 8, 16], strides = [1, 1, 1]} : vector<2x8x64xf32> to vector<2x8x16xf32>
    %cst_38 = arith.constant 2.500000e-01 : f32
    %72 = vector.broadcast %cst_38 : f32 to vector<2x8x16xf32>
    %73 = arith.mulf %71, %72 : vector<2x8x16xf32>
    %74 = vector.extract_strided_slice %45 {offsets = [0, 0, 16], sizes = [2, 8, 16], strides = [1, 1, 1]} : vector<2x8x64xf32> to vector<2x8x16xf32>
    "tpu.trace_start"() <{level = 10 : i32, message = "bqd,bkd->bqk"}> : () -> ()
    %cst_39 = arith.constant dense<0.000000e+00> : vector<2x8x8xf32>
    %75 = tpu.matmul %73, %74, %cst_39 {dimension_numbers = #tpu.dot_dimension_numbers<[2], [2], [1], [1], [0, 0, 0, 1, 1, 1], [0], [0]>} : vector<2x8x16xf32>, vector<2x8x16xf32>, vector<2x8x8xf32> -> vector<2x8x8xf32>
    "tpu.trace_stop"() : () -> ()
    %76 = vector.broadcast %51 : vector<2x1x8xf32> to vector<2x8x8xf32>
    %77 = arith.addf %75, %76 : vector<2x8x8xf32>
    %cst_40 = arith.constant dense<0xFF800000> : vector<2x8xf32>
    %78 = vector.multi_reduction <maximumf>, %77, %cst_40 [2] : vector<2x8x8xf32> to vector<2x8xf32>
    %79 = vector.shape_cast %78 : vector<2x8xf32> to vector<2x8x1xf32>
    %80 = vector.broadcast %79 : vector<2x8x1xf32> to vector<2x8x8xf32>
    %81 = arith.subf %77, %80 : vector<2x8x8xf32>
    %82 = math.exp %81 : vector<2x8x8xf32>
    %cst_41 = arith.constant dense<0.000000e+00> : vector<2x8xf32>
    %83 = vector.multi_reduction <add>, %82, %cst_41 [2] : vector<2x8x8xf32> to vector<2x8xf32>
    %84 = vector.shape_cast %83 : vector<2x8xf32> to vector<2x8x1xf32>
    %85 = tpu.reciprocal %84 {approx = true} : vector<2x8x1xf32> -> vector<2x8x1xf32>
    %86 = vector.broadcast %85 : vector<2x8x1xf32> to vector<2x8x8xf32>
    %87 = arith.mulf %82, %86 : vector<2x8x8xf32>
    %88 = vector.extract_strided_slice %46 {offsets = [0, 0, 16], sizes = [2, 8, 16], strides = [1, 1, 1]} : vector<2x8x64xf32> to vector<2x8x16xf32>
    "tpu.trace_start"() <{level = 10 : i32, message = "bqk,bkd->bqd"}> : () -> ()
    %cst_42 = arith.constant dense<0.000000e+00> : vector<2x8x16xf32>
    %89 = tpu.matmul %87, %88, %cst_42 {dimension_numbers = #tpu.dot_dimension_numbers<[2], [1], [1], [2], [0, 0, 0, 1, 1, 2], [0], [0]>} : vector<2x8x8xf32>, vector<2x8x16xf32>, vector<2x8x16xf32> -> vector<2x8x16xf32>
    "tpu.trace_stop"() : () -> ()
    %90 = vector.extract_strided_slice %44 {offsets = [0, 0, 32], sizes = [2, 8, 16], strides = [1, 1, 1]} : vector<2x8x64xf32> to vector<2x8x16xf32>
    %cst_43 = arith.constant 2.500000e-01 : f32
    %91 = vector.broadcast %cst_43 : f32 to vector<2x8x16xf32>
    %92 = arith.mulf %90, %91 : vector<2x8x16xf32>
    %93 = vector.extract_strided_slice %45 {offsets = [0, 0, 32], sizes = [2, 8, 16], strides = [1, 1, 1]} : vector<2x8x64xf32> to vector<2x8x16xf32>
    "tpu.trace_start"() <{level = 10 : i32, message = "bqd,bkd->bqk"}> : () -> ()
    %cst_44 = arith.constant dense<0.000000e+00> : vector<2x8x8xf32>
    %94 = tpu.matmul %92, %93, %cst_44 {dimension_numbers = #tpu.dot_dimension_numbers<[2], [2], [1], [1], [0, 0, 0, 1, 1, 1], [0], [0]>} : vector<2x8x16xf32>, vector<2x8x16xf32>, vector<2x8x8xf32> -> vector<2x8x8xf32>
    "tpu.trace_stop"() : () -> ()
    %95 = vector.broadcast %51 : vector<2x1x8xf32> to vector<2x8x8xf32>
    %96 = arith.addf %94, %95 : vector<2x8x8xf32>
    %cst_45 = arith.constant dense<0xFF800000> : vector<2x8xf32>
    %97 = vector.multi_reduction <maximumf>, %96, %cst_45 [2] : vector<2x8x8xf32> to vector<2x8xf32>
    %98 = vector.shape_cast %97 : vector<2x8xf32> to vector<2x8x1xf32>
    %99 = vector.broadcast %98 : vector<2x8x1xf32> to vector<2x8x8xf32>
    %100 = arith.subf %96, %99 : vector<2x8x8xf32>
    %101 = math.exp %100 : vector<2x8x8xf32>
    %cst_46 = arith.constant dense<0.000000e+00> : vector<2x8xf32>
    %102 = vector.multi_reduction <add>, %101, %cst_46 [2] : vector<2x8x8xf32> to vector<2x8xf32>
    %103 = vector.shape_cast %102 : vector<2x8xf32> to vector<2x8x1xf32>
    %104 = tpu.reciprocal %103 {approx = true} : vector<2x8x1xf32> -> vector<2x8x1xf32>
    %105 = vector.broadcast %104 : vector<2x8x1xf32> to vector<2x8x8xf32>
    %106 = arith.mulf %101, %105 : vector<2x8x8xf32>
    %107 = vector.extract_strided_slice %46 {offsets = [0, 0, 32], sizes = [2, 8, 16], strides = [1, 1, 1]} : vector<2x8x64xf32> to vector<2x8x16xf32>
    "tpu.trace_start"() <{level = 10 : i32, message = "bqk,bkd->bqd"}> : () -> ()
    %cst_47 = arith.constant dense<0.000000e+00> : vector<2x8x16xf32>
    %108 = tpu.matmul %106, %107, %cst_47 {dimension_numbers = #tpu.dot_dimension_numbers<[2], [1], [1], [2], [0, 0, 0, 1, 1, 2], [0], [0]>} : vector<2x8x8xf32>, vector<2x8x16xf32>, vector<2x8x16xf32> -> vector<2x8x16xf32>
    "tpu.trace_stop"() : () -> ()
    %109 = vector.extract_strided_slice %44 {offsets = [0, 0, 48], sizes = [2, 8, 16], strides = [1, 1, 1]} : vector<2x8x64xf32> to vector<2x8x16xf32>
    %cst_48 = arith.constant 2.500000e-01 : f32
    %110 = vector.broadcast %cst_48 : f32 to vector<2x8x16xf32>
    %111 = arith.mulf %109, %110 : vector<2x8x16xf32>
    %112 = vector.extract_strided_slice %45 {offsets = [0, 0, 48], sizes = [2, 8, 16], strides = [1, 1, 1]} : vector<2x8x64xf32> to vector<2x8x16xf32>
    "tpu.trace_start"() <{level = 10 : i32, message = "bqd,bkd->bqk"}> : () -> ()
    %cst_49 = arith.constant dense<0.000000e+00> : vector<2x8x8xf32>
    %113 = tpu.matmul %111, %112, %cst_49 {dimension_numbers = #tpu.dot_dimension_numbers<[2], [2], [1], [1], [0, 0, 0, 1, 1, 1], [0], [0]>} : vector<2x8x16xf32>, vector<2x8x16xf32>, vector<2x8x8xf32> -> vector<2x8x8xf32>
    "tpu.trace_stop"() : () -> ()
    %114 = vector.broadcast %51 : vector<2x1x8xf32> to vector<2x8x8xf32>
    %115 = arith.addf %113, %114 : vector<2x8x8xf32>
    %cst_50 = arith.constant dense<0xFF800000> : vector<2x8xf32>
    %116 = vector.multi_reduction <maximumf>, %115, %cst_50 [2] : vector<2x8x8xf32> to vector<2x8xf32>
    %117 = vector.shape_cast %116 : vector<2x8xf32> to vector<2x8x1xf32>
    %118 = vector.broadcast %117 : vector<2x8x1xf32> to vector<2x8x8xf32>
    %119 = arith.subf %115, %118 : vector<2x8x8xf32>
    %120 = math.exp %119 : vector<2x8x8xf32>
    %cst_51 = arith.constant dense<0.000000e+00> : vector<2x8xf32>
    %121 = vector.multi_reduction <add>, %120, %cst_51 [2] : vector<2x8x8xf32> to vector<2x8xf32>
    %122 = vector.shape_cast %121 : vector<2x8xf32> to vector<2x8x1xf32>
    %123 = tpu.reciprocal %122 {approx = true} : vector<2x8x1xf32> -> vector<2x8x1xf32>
    %124 = vector.broadcast %123 : vector<2x8x1xf32> to vector<2x8x8xf32>
    %125 = arith.mulf %120, %124 : vector<2x8x8xf32>
    %126 = vector.extract_strided_slice %46 {offsets = [0, 0, 48], sizes = [2, 8, 16], strides = [1, 1, 1]} : vector<2x8x64xf32> to vector<2x8x16xf32>
    "tpu.trace_start"() <{level = 10 : i32, message = "bqk,bkd->bqd"}> : () -> ()
    %cst_52 = arith.constant dense<0.000000e+00> : vector<2x8x16xf32>
    %127 = tpu.matmul %125, %126, %cst_52 {dimension_numbers = #tpu.dot_dimension_numbers<[2], [1], [1], [2], [0, 0, 0, 1, 1, 2], [0], [0]>} : vector<2x8x8xf32>, vector<2x8x16xf32>, vector<2x8x16xf32> -> vector<2x8x16xf32>
    "tpu.trace_stop"() : () -> ()
    %128 = tpu.concatenate %70, %89, %108, %127 in 2 : vector<2x8x16xf32>, vector<2x8x16xf32>, vector<2x8x16xf32>, vector<2x8x16xf32> -> vector<2x8x64xf32>
    %129 = vector.shape_cast %128 : vector<2x8x64xf32> to vector<16x64xf32>
    %130 = arith.truncf %129 : vector<16x64xf32> to vector<16x64xbf16>
    %cst_53 = arith.constant dense<0.000000e+00> : vector<16x64xf32>
    %131 = tpu.matmul %130, %31, %cst_53 {dimension_numbers = #tpu.dot_dimension_numbers<[1], [0], [0], [1], [0, 0, 1, 1], [], []>} : vector<16x64xbf16>, vector<64x64xbf16>, vector<16x64xf32> -> vector<16x64xf32>
    %132 = vector.broadcast %33 : vector<1x64xf32> to vector<16x64xf32>
    %133 = arith.addf %131, %132 : vector<16x64xf32>
    %134 = vector.shape_cast %133 : vector<16x64xf32> to vector<2x8x64xf32>
    %135 = arith.addf %134, %24 : vector<2x8x64xf32>
    %cst_54 = arith.constant dense<0.000000e+00> : vector<2x8xf32>
    %136 = vector.multi_reduction <add>, %135, %cst_54 [2] : vector<2x8x64xf32> to vector<2x8xf32>
    %137 = vector.shape_cast %136 : vector<2x8xf32> to vector<2x8x1xf32>
    %cst_55 = arith.constant 6.400000e+01 : f32
    %138 = vector.broadcast %cst_55 : f32 to vector<2x8x1xf32>
    %139 = arith.divf %137, %138 : vector<2x8x1xf32>
    %140 = vector.broadcast %139 : vector<2x8x1xf32> to vector<2x8x64xf32>
    %141 = arith.subf %135, %140 : vector<2x8x64xf32>
    %142 = arith.mulf %141, %141 : vector<2x8x64xf32>
    %cst_56 = arith.constant dense<0.000000e+00> : vector<2x8xf32>
    %143 = vector.multi_reduction <add>, %142, %cst_56 [2] : vector<2x8x64xf32> to vector<2x8xf32>
    %144 = vector.shape_cast %143 : vector<2x8xf32> to vector<2x8x1xf32>
    %cst_57 = arith.constant 6.400000e+01 : f32
    %145 = vector.broadcast %cst_57 : f32 to vector<2x8x1xf32>
    %146 = arith.divf %144, %145 : vector<2x8x1xf32>
    %cst_58 = arith.constant 9.99999996E-13 : f32
    %147 = vector.broadcast %cst_58 : f32 to vector<2x8x1xf32>
    %148 = arith.addf %146, %147 : vector<2x8x1xf32>
    %149 = math.rsqrt %148 : vector<2x8x1xf32>
    %150 = vector.broadcast %149 : vector<2x8x1xf32> to vector<2x8x64xf32>
    %151 = arith.mulf %141, %150 : vector<2x8x64xf32>
    %152 = vector.shape_cast %35 : vector<1x64xf32> to vector<1x1x64xf32>
    %153 = vector.broadcast %152 : vector<1x1x64xf32> to vector<2x8x64xf32>
    %154 = arith.mulf %151, %153 : vector<2x8x64xf32>
    %155 = vector.shape_cast %37 : vector<1x64xf32> to vector<1x1x64xf32>
    %156 = vector.broadcast %155 : vector<1x1x64xf32> to vector<2x8x64xf32>
    %157 = arith.addf %154, %156 : vector<2x8x64xf32>
    %c0_59 = arith.constant 0 : index
    %c0_60 = arith.constant 0 : index
    %c0_61 = arith.constant 0 : index
    %158 = vector.load %arg10[%c0_59, %c0_60, %c0_61] : memref<2x64x128xbf16, #tpu.memory_space<vmem>>, vector<1x64x128xbf16>
    %159 = vector.shape_cast %158 : vector<1x64x128xbf16> to vector<64x128xbf16>
    %c0_62 = arith.constant 0 : index
    %c0_63 = arith.constant 0 : index
    %c0_64 = arith.constant 0 : index
    %160 = vector.load %arg11[%c0_62, %c0_63, %c0_64] : memref<2x1x128xf32, #tpu.memory_space<vmem>>, vector<1x1x128xf32>
    %161 = vector.shape_cast %160 : vector<1x1x128xf32> to vector<1x128xf32>
    %c0_65 = arith.constant 0 : index
    %c0_66 = arith.constant 0 : index
    %c0_67 = arith.constant 0 : index
    %162 = vector.load %arg12[%c0_65, %c0_66, %c0_67] : memref<2x128x64xbf16, #tpu.memory_space<vmem>>, vector<1x128x64xbf16>
    %163 = vector.shape_cast %162 : vector<1x128x64xbf16> to vector<128x64xbf16>
    %c0_68 = arith.constant 0 : index
    %c0_69 = arith.constant 0 : index
    %c0_70 = arith.constant 0 : index
    %164 = vector.load %arg13[%c0_68, %c0_69, %c0_70] : memref<2x1x64xf32, #tpu.memory_space<vmem>>, vector<1x1x64xf32>
    %165 = vector.shape_cast %164 : vector<1x1x64xf32> to vector<1x64xf32>
    %c0_71 = arith.constant 0 : index
    %c0_72 = arith.constant 0 : index
    %c0_73 = arith.constant 0 : index
    %166 = vector.load %arg14[%c0_71, %c0_72, %c0_73] : memref<2x1x64xf32, #tpu.memory_space<vmem>>, vector<1x1x64xf32>
    %167 = vector.shape_cast %166 : vector<1x1x64xf32> to vector<1x64xf32>
    %c0_74 = arith.constant 0 : index
    %c0_75 = arith.constant 0 : index
    %c0_76 = arith.constant 0 : index
    %168 = vector.load %arg15[%c0_74, %c0_75, %c0_76] : memref<2x1x64xf32, #tpu.memory_space<vmem>>, vector<1x1x64xf32>
    %169 = vector.shape_cast %168 : vector<1x1x64xf32> to vector<1x64xf32>
    %170 = vector.shape_cast %157 : vector<2x8x64xf32> to vector<16x64xf32>
    %171 = arith.truncf %170 : vector<16x64xf32> to vector<16x64xbf16>
    %cst_77 = arith.constant dense<0.000000e+00> : vector<16x128xf32>
    %172 = tpu.matmul %171, %159, %cst_77 {dimension_numbers = #tpu.dot_dimension_numbers<[1], [0], [0], [1], [0, 0, 1, 1], [], []>} : vector<16x64xbf16>, vector<64x128xbf16>, vector<16x128xf32> -> vector<16x128xf32>
    %173 = vector.broadcast %161 : vector<1x128xf32> to vector<16x128xf32>
    %174 = arith.addf %172, %173 : vector<16x128xf32>
    %175 = vector.shape_cast %174 : vector<16x128xf32> to vector<2x8x128xf32>
    %176 = arith.mulf %175, %175 : vector<2x8x128xf32>
    %177 = arith.mulf %175, %176 : vector<2x8x128xf32>
    %cst_78 = arith.constant 4.471500e-02 : f32
    %178 = vector.broadcast %cst_78 : f32 to vector<2x8x128xf32>
    %179 = arith.mulf %178, %177 : vector<2x8x128xf32>
    %180 = arith.addf %175, %179 : vector<2x8x128xf32>
    %cst_79 = arith.constant 0.797884583 : f32
    %181 = vector.broadcast %cst_79 : f32 to vector<2x8x128xf32>
    %182 = arith.mulf %181, %180 : vector<2x8x128xf32>
    %183 = math.tanh %182 : vector<2x8x128xf32>
    %cst_80 = arith.constant 1.000000e+00 : f32
    %184 = vector.broadcast %cst_80 : f32 to vector<2x8x128xf32>
    %185 = arith.addf %184, %183 : vector<2x8x128xf32>
    %cst_81 = arith.constant 5.000000e-01 : f32
    %186 = vector.broadcast %cst_81 : f32 to vector<2x8x128xf32>
    %187 = arith.mulf %186, %185 : vector<2x8x128xf32>
    %188 = arith.mulf %175, %187 : vector<2x8x128xf32>
    %189 = vector.shape_cast %188 : vector<2x8x128xf32> to vector<16x128xf32>
    %190 = arith.truncf %189 : vector<16x128xf32> to vector<16x128xbf16>
    %cst_82 = arith.constant dense<0.000000e+00> : vector<16x64xf32>
    %191 = tpu.matmul %190, %163, %cst_82 {dimension_numbers = #tpu.dot_dimension_numbers<[1], [0], [0], [1], [0, 0, 1, 1], [], []>} : vector<16x128xbf16>, vector<128x64xbf16>, vector<16x64xf32> -> vector<16x64xf32>
    %192 = vector.broadcast %165 : vector<1x64xf32> to vector<16x64xf32>
    %193 = arith.addf %191, %192 : vector<16x64xf32>
    %194 = vector.shape_cast %193 : vector<16x64xf32> to vector<2x8x64xf32>
    %195 = arith.addf %194, %157 : vector<2x8x64xf32>
    %cst_83 = arith.constant dense<0.000000e+00> : vector<2x8xf32>
    %196 = vector.multi_reduction <add>, %195, %cst_83 [2] : vector<2x8x64xf32> to vector<2x8xf32>
    %197 = vector.shape_cast %196 : vector<2x8xf32> to vector<2x8x1xf32>
    %cst_84 = arith.constant 6.400000e+01 : f32
    %198 = vector.broadcast %cst_84 : f32 to vector<2x8x1xf32>
    %199 = arith.divf %197, %198 : vector<2x8x1xf32>
    %200 = vector.broadcast %199 : vector<2x8x1xf32> to vector<2x8x64xf32>
    %201 = arith.subf %195, %200 : vector<2x8x64xf32>
    %202 = arith.mulf %201, %201 : vector<2x8x64xf32>
    %cst_85 = arith.constant dense<0.000000e+00> : vector<2x8xf32>
    %203 = vector.multi_reduction <add>, %202, %cst_85 [2] : vector<2x8x64xf32> to vector<2x8xf32>
    %204 = vector.shape_cast %203 : vector<2x8xf32> to vector<2x8x1xf32>
    %cst_86 = arith.constant 6.400000e+01 : f32
    %205 = vector.broadcast %cst_86 : f32 to vector<2x8x1xf32>
    %206 = arith.divf %204, %205 : vector<2x8x1xf32>
    %cst_87 = arith.constant 9.99999996E-13 : f32
    %207 = vector.broadcast %cst_87 : f32 to vector<2x8x1xf32>
    %208 = arith.addf %206, %207 : vector<2x8x1xf32>
    %209 = math.rsqrt %208 : vector<2x8x1xf32>
    %210 = vector.broadcast %209 : vector<2x8x1xf32> to vector<2x8x64xf32>
    %211 = arith.mulf %201, %210 : vector<2x8x64xf32>
    %212 = vector.shape_cast %167 : vector<1x64xf32> to vector<1x1x64xf32>
    %213 = vector.broadcast %212 : vector<1x1x64xf32> to vector<2x8x64xf32>
    %214 = arith.mulf %211, %213 : vector<2x8x64xf32>
    %215 = vector.shape_cast %169 : vector<1x64xf32> to vector<1x1x64xf32>
    %216 = vector.broadcast %215 : vector<1x1x64xf32> to vector<2x8x64xf32>
    %217 = arith.addf %214, %216 : vector<2x8x64xf32>
    %c1 = arith.constant 1 : index
    %c0_88 = arith.constant 0 : index
    %c0_89 = arith.constant 0 : index
    %218 = vector.load %arg4[%c1, %c0_88, %c0_89] : memref<2x64x192xbf16, #tpu.memory_space<vmem>>, vector<1x64x192xbf16>
    %219 = vector.shape_cast %218 : vector<1x64x192xbf16> to vector<64x192xbf16>
    %c1_90 = arith.constant 1 : index
    %c0_91 = arith.constant 0 : index
    %c0_92 = arith.constant 0 : index
    %220 = vector.load %arg5[%c1_90, %c0_91, %c0_92] : memref<2x1x192xf32, #tpu.memory_space<vmem>>, vector<1x1x192xf32>
    %221 = vector.shape_cast %220 : vector<1x1x192xf32> to vector<1x192xf32>
    %c1_93 = arith.constant 1 : index
    %c0_94 = arith.constant 0 : index
    %c0_95 = arith.constant 0 : index
    %222 = vector.load %arg6[%c1_93, %c0_94, %c0_95] : memref<2x64x64xbf16, #tpu.memory_space<vmem>>, vector<1x64x64xbf16>
    %223 = vector.shape_cast %222 : vector<1x64x64xbf16> to vector<64x64xbf16>
    %c1_96 = arith.constant 1 : index
    %c0_97 = arith.constant 0 : index
    %c0_98 = arith.constant 0 : index
    %224 = vector.load %arg7[%c1_96, %c0_97, %c0_98] : memref<2x1x64xf32, #tpu.memory_space<vmem>>, vector<1x1x64xf32>
    %225 = vector.shape_cast %224 : vector<1x1x64xf32> to vector<1x64xf32>
    %c1_99 = arith.constant 1 : index
    %c0_100 = arith.constant 0 : index
    %c0_101 = arith.constant 0 : index
    %226 = vector.load %arg8[%c1_99, %c0_100, %c0_101] : memref<2x1x64xf32, #tpu.memory_space<vmem>>, vector<1x1x64xf32>
    %227 = vector.shape_cast %226 : vector<1x1x64xf32> to vector<1x64xf32>
    %c1_102 = arith.constant 1 : index
    %c0_103 = arith.constant 0 : index
    %c0_104 = arith.constant 0 : index
    %228 = vector.load %arg9[%c1_102, %c0_103, %c0_104] : memref<2x1x64xf32, #tpu.memory_space<vmem>>, vector<1x1x64xf32>
    %229 = vector.shape_cast %228 : vector<1x1x64xf32> to vector<1x64xf32>
    %230 = vector.shape_cast %217 : vector<2x8x64xf32> to vector<16x64xf32>
    %231 = arith.truncf %230 : vector<16x64xf32> to vector<16x64xbf16>
    %cst_105 = arith.constant dense<0.000000e+00> : vector<16x192xf32>
    %232 = tpu.matmul %231, %219, %cst_105 {dimension_numbers = #tpu.dot_dimension_numbers<[1], [0], [0], [1], [0, 0, 1, 1], [], []>} : vector<16x64xbf16>, vector<64x192xbf16>, vector<16x192xf32> -> vector<16x192xf32>
    %233 = vector.broadcast %221 : vector<1x192xf32> to vector<16x192xf32>
    %234 = arith.addf %232, %233 : vector<16x192xf32>
    %235 = vector.shape_cast %234 : vector<16x192xf32> to vector<2x8x192xf32>
    %236 = vector.extract_strided_slice %235 {offsets = [0, 0, 0], sizes = [2, 8, 64], strides = [1, 1, 1]} : vector<2x8x192xf32> to vector<2x8x64xf32>
    %237 = vector.extract_strided_slice %235 {offsets = [0, 0, 64], sizes = [2, 8, 64], strides = [1, 1, 1]} : vector<2x8x192xf32> to vector<2x8x64xf32>
    %238 = vector.extract_strided_slice %235 {offsets = [0, 0, 128], sizes = [2, 8, 64], strides = [1, 1, 1]} : vector<2x8x192xf32> to vector<2x8x64xf32>
    %cst_106 = arith.constant 1.000000e+00 : f32
    %239 = vector.broadcast %cst_106 : f32 to vector<2x8xf32>
    %240 = arith.subf %25, %239 : vector<2x8xf32>
    %241 = vector.shape_cast %240 : vector<2x8xf32> to vector<2x1x8xf32>
    %cst_107 = arith.constant 1.000000e+09 : f32
    %242 = vector.broadcast %cst_107 : f32 to vector<2x1x8xf32>
    %243 = arith.mulf %241, %242 : vector<2x1x8xf32>
    %244 = vector.extract_strided_slice %236 {offsets = [0, 0, 0], sizes = [2, 8, 16], strides = [1, 1, 1]} : vector<2x8x64xf32> to vector<2x8x16xf32>
    %cst_108 = arith.constant 2.500000e-01 : f32
    %245 = vector.broadcast %cst_108 : f32 to vector<2x8x16xf32>
    %246 = arith.mulf %244, %245 : vector<2x8x16xf32>
    %247 = vector.extract_strided_slice %237 {offsets = [0, 0, 0], sizes = [2, 8, 16], strides = [1, 1, 1]} : vector<2x8x64xf32> to vector<2x8x16xf32>
    "tpu.trace_start"() <{level = 10 : i32, message = "bqd,bkd->bqk"}> : () -> ()
    %cst_109 = arith.constant dense<0.000000e+00> : vector<2x8x8xf32>
    %248 = tpu.matmul %246, %247, %cst_109 {dimension_numbers = #tpu.dot_dimension_numbers<[2], [2], [1], [1], [0, 0, 0, 1, 1, 1], [0], [0]>} : vector<2x8x16xf32>, vector<2x8x16xf32>, vector<2x8x8xf32> -> vector<2x8x8xf32>
    "tpu.trace_stop"() : () -> ()
    %249 = vector.broadcast %243 : vector<2x1x8xf32> to vector<2x8x8xf32>
    %250 = arith.addf %248, %249 : vector<2x8x8xf32>
    %cst_110 = arith.constant dense<0xFF800000> : vector<2x8xf32>
    %251 = vector.multi_reduction <maximumf>, %250, %cst_110 [2] : vector<2x8x8xf32> to vector<2x8xf32>
    %252 = vector.shape_cast %251 : vector<2x8xf32> to vector<2x8x1xf32>
    %253 = vector.broadcast %252 : vector<2x8x1xf32> to vector<2x8x8xf32>
    %254 = arith.subf %250, %253 : vector<2x8x8xf32>
    %255 = math.exp %254 : vector<2x8x8xf32>
    %cst_111 = arith.constant dense<0.000000e+00> : vector<2x8xf32>
    %256 = vector.multi_reduction <add>, %255, %cst_111 [2] : vector<2x8x8xf32> to vector<2x8xf32>
    %257 = vector.shape_cast %256 : vector<2x8xf32> to vector<2x8x1xf32>
    %258 = tpu.reciprocal %257 {approx = true} : vector<2x8x1xf32> -> vector<2x8x1xf32>
    %259 = vector.broadcast %258 : vector<2x8x1xf32> to vector<2x8x8xf32>
    %260 = arith.mulf %255, %259 : vector<2x8x8xf32>
    %261 = vector.extract_strided_slice %238 {offsets = [0, 0, 0], sizes = [2, 8, 16], strides = [1, 1, 1]} : vector<2x8x64xf32> to vector<2x8x16xf32>
    "tpu.trace_start"() <{level = 10 : i32, message = "bqk,bkd->bqd"}> : () -> ()
    %cst_112 = arith.constant dense<0.000000e+00> : vector<2x8x16xf32>
    %262 = tpu.matmul %260, %261, %cst_112 {dimension_numbers = #tpu.dot_dimension_numbers<[2], [1], [1], [2], [0, 0, 0, 1, 1, 2], [0], [0]>} : vector<2x8x8xf32>, vector<2x8x16xf32>, vector<2x8x16xf32> -> vector<2x8x16xf32>
    "tpu.trace_stop"() : () -> ()
    %263 = vector.extract_strided_slice %236 {offsets = [0, 0, 16], sizes = [2, 8, 16], strides = [1, 1, 1]} : vector<2x8x64xf32> to vector<2x8x16xf32>
    %cst_113 = arith.constant 2.500000e-01 : f32
    %264 = vector.broadcast %cst_113 : f32 to vector<2x8x16xf32>
    %265 = arith.mulf %263, %264 : vector<2x8x16xf32>
    %266 = vector.extract_strided_slice %237 {offsets = [0, 0, 16], sizes = [2, 8, 16], strides = [1, 1, 1]} : vector<2x8x64xf32> to vector<2x8x16xf32>
    "tpu.trace_start"() <{level = 10 : i32, message = "bqd,bkd->bqk"}> : () -> ()
    %cst_114 = arith.constant dense<0.000000e+00> : vector<2x8x8xf32>
    %267 = tpu.matmul %265, %266, %cst_114 {dimension_numbers = #tpu.dot_dimension_numbers<[2], [2], [1], [1], [0, 0, 0, 1, 1, 1], [0], [0]>} : vector<2x8x16xf32>, vector<2x8x16xf32>, vector<2x8x8xf32> -> vector<2x8x8xf32>
    "tpu.trace_stop"() : () -> ()
    %268 = vector.broadcast %243 : vector<2x1x8xf32> to vector<2x8x8xf32>
    %269 = arith.addf %267, %268 : vector<2x8x8xf32>
    %cst_115 = arith.constant dense<0xFF800000> : vector<2x8xf32>
    %270 = vector.multi_reduction <maximumf>, %269, %cst_115 [2] : vector<2x8x8xf32> to vector<2x8xf32>
    %271 = vector.shape_cast %270 : vector<2x8xf32> to vector<2x8x1xf32>
    %272 = vector.broadcast %271 : vector<2x8x1xf32> to vector<2x8x8xf32>
    %273 = arith.subf %269, %272 : vector<2x8x8xf32>
    %274 = math.exp %273 : vector<2x8x8xf32>
    %cst_116 = arith.constant dense<0.000000e+00> : vector<2x8xf32>
    %275 = vector.multi_reduction <add>, %274, %cst_116 [2] : vector<2x8x8xf32> to vector<2x8xf32>
    %276 = vector.shape_cast %275 : vector<2x8xf32> to vector<2x8x1xf32>
    %277 = tpu.reciprocal %276 {approx = true} : vector<2x8x1xf32> -> vector<2x8x1xf32>
    %278 = vector.broadcast %277 : vector<2x8x1xf32> to vector<2x8x8xf32>
    %279 = arith.mulf %274, %278 : vector<2x8x8xf32>
    %280 = vector.extract_strided_slice %238 {offsets = [0, 0, 16], sizes = [2, 8, 16], strides = [1, 1, 1]} : vector<2x8x64xf32> to vector<2x8x16xf32>
    "tpu.trace_start"() <{level = 10 : i32, message = "bqk,bkd->bqd"}> : () -> ()
    %cst_117 = arith.constant dense<0.000000e+00> : vector<2x8x16xf32>
    %281 = tpu.matmul %279, %280, %cst_117 {dimension_numbers = #tpu.dot_dimension_numbers<[2], [1], [1], [2], [0, 0, 0, 1, 1, 2], [0], [0]>} : vector<2x8x8xf32>, vector<2x8x16xf32>, vector<2x8x16xf32> -> vector<2x8x16xf32>
    "tpu.trace_stop"() : () -> ()
    %282 = vector.extract_strided_slice %236 {offsets = [0, 0, 32], sizes = [2, 8, 16], strides = [1, 1, 1]} : vector<2x8x64xf32> to vector<2x8x16xf32>
    %cst_118 = arith.constant 2.500000e-01 : f32
    %283 = vector.broadcast %cst_118 : f32 to vector<2x8x16xf32>
    %284 = arith.mulf %282, %283 : vector<2x8x16xf32>
    %285 = vector.extract_strided_slice %237 {offsets = [0, 0, 32], sizes = [2, 8, 16], strides = [1, 1, 1]} : vector<2x8x64xf32> to vector<2x8x16xf32>
    "tpu.trace_start"() <{level = 10 : i32, message = "bqd,bkd->bqk"}> : () -> ()
    %cst_119 = arith.constant dense<0.000000e+00> : vector<2x8x8xf32>
    %286 = tpu.matmul %284, %285, %cst_119 {dimension_numbers = #tpu.dot_dimension_numbers<[2], [2], [1], [1], [0, 0, 0, 1, 1, 1], [0], [0]>} : vector<2x8x16xf32>, vector<2x8x16xf32>, vector<2x8x8xf32> -> vector<2x8x8xf32>
    "tpu.trace_stop"() : () -> ()
    %287 = vector.broadcast %243 : vector<2x1x8xf32> to vector<2x8x8xf32>
    %288 = arith.addf %286, %287 : vector<2x8x8xf32>
    %cst_120 = arith.constant dense<0xFF800000> : vector<2x8xf32>
    %289 = vector.multi_reduction <maximumf>, %288, %cst_120 [2] : vector<2x8x8xf32> to vector<2x8xf32>
    %290 = vector.shape_cast %289 : vector<2x8xf32> to vector<2x8x1xf32>
    %291 = vector.broadcast %290 : vector<2x8x1xf32> to vector<2x8x8xf32>
    %292 = arith.subf %288, %291 : vector<2x8x8xf32>
    %293 = math.exp %292 : vector<2x8x8xf32>
    %cst_121 = arith.constant dense<0.000000e+00> : vector<2x8xf32>
    %294 = vector.multi_reduction <add>, %293, %cst_121 [2] : vector<2x8x8xf32> to vector<2x8xf32>
    %295 = vector.shape_cast %294 : vector<2x8xf32> to vector<2x8x1xf32>
    %296 = tpu.reciprocal %295 {approx = true} : vector<2x8x1xf32> -> vector<2x8x1xf32>
    %297 = vector.broadcast %296 : vector<2x8x1xf32> to vector<2x8x8xf32>
    %298 = arith.mulf %293, %297 : vector<2x8x8xf32>
    %299 = vector.extract_strided_slice %238 {offsets = [0, 0, 32], sizes = [2, 8, 16], strides = [1, 1, 1]} : vector<2x8x64xf32> to vector<2x8x16xf32>
    "tpu.trace_start"() <{level = 10 : i32, message = "bqk,bkd->bqd"}> : () -> ()
    %cst_122 = arith.constant dense<0.000000e+00> : vector<2x8x16xf32>
    %300 = tpu.matmul %298, %299, %cst_122 {dimension_numbers = #tpu.dot_dimension_numbers<[2], [1], [1], [2], [0, 0, 0, 1, 1, 2], [0], [0]>} : vector<2x8x8xf32>, vector<2x8x16xf32>, vector<2x8x16xf32> -> vector<2x8x16xf32>
    "tpu.trace_stop"() : () -> ()
    %301 = vector.extract_strided_slice %236 {offsets = [0, 0, 48], sizes = [2, 8, 16], strides = [1, 1, 1]} : vector<2x8x64xf32> to vector<2x8x16xf32>
    %cst_123 = arith.constant 2.500000e-01 : f32
    %302 = vector.broadcast %cst_123 : f32 to vector<2x8x16xf32>
    %303 = arith.mulf %301, %302 : vector<2x8x16xf32>
    %304 = vector.extract_strided_slice %237 {offsets = [0, 0, 48], sizes = [2, 8, 16], strides = [1, 1, 1]} : vector<2x8x64xf32> to vector<2x8x16xf32>
    "tpu.trace_start"() <{level = 10 : i32, message = "bqd,bkd->bqk"}> : () -> ()
    %cst_124 = arith.constant dense<0.000000e+00> : vector<2x8x8xf32>
    %305 = tpu.matmul %303, %304, %cst_124 {dimension_numbers = #tpu.dot_dimension_numbers<[2], [2], [1], [1], [0, 0, 0, 1, 1, 1], [0], [0]>} : vector<2x8x16xf32>, vector<2x8x16xf32>, vector<2x8x8xf32> -> vector<2x8x8xf32>
    "tpu.trace_stop"() : () -> ()
    %306 = vector.broadcast %243 : vector<2x1x8xf32> to vector<2x8x8xf32>
    %307 = arith.addf %305, %306 : vector<2x8x8xf32>
    %cst_125 = arith.constant dense<0xFF800000> : vector<2x8xf32>
    %308 = vector.multi_reduction <maximumf>, %307, %cst_125 [2] : vector<2x8x8xf32> to vector<2x8xf32>
    %309 = vector.shape_cast %308 : vector<2x8xf32> to vector<2x8x1xf32>
    %310 = vector.broadcast %309 : vector<2x8x1xf32> to vector<2x8x8xf32>
    %311 = arith.subf %307, %310 : vector<2x8x8xf32>
    %312 = math.exp %311 : vector<2x8x8xf32>
    %cst_126 = arith.constant dense<0.000000e+00> : vector<2x8xf32>
    %313 = vector.multi_reduction <add>, %312, %cst_126 [2] : vector<2x8x8xf32> to vector<2x8xf32>
    %314 = vector.shape_cast %313 : vector<2x8xf32> to vector<2x8x1xf32>
    %315 = tpu.reciprocal %314 {approx = true} : vector<2x8x1xf32> -> vector<2x8x1xf32>
    %316 = vector.broadcast %315 : vector<2x8x1xf32> to vector<2x8x8xf32>
    %317 = arith.mulf %312, %316 : vector<2x8x8xf32>
    %318 = vector.extract_strided_slice %238 {offsets = [0, 0, 48], sizes = [2, 8, 16], strides = [1, 1, 1]} : vector<2x8x64xf32> to vector<2x8x16xf32>
    "tpu.trace_start"() <{level = 10 : i32, message = "bqk,bkd->bqd"}> : () -> ()
    %cst_127 = arith.constant dense<0.000000e+00> : vector<2x8x16xf32>
    %319 = tpu.matmul %317, %318, %cst_127 {dimension_numbers = #tpu.dot_dimension_numbers<[2], [1], [1], [2], [0, 0, 0, 1, 1, 2], [0], [0]>} : vector<2x8x8xf32>, vector<2x8x16xf32>, vector<2x8x16xf32> -> vector<2x8x16xf32>
    "tpu.trace_stop"() : () -> ()
    %320 = tpu.concatenate %262, %281, %300, %319 in 2 : vector<2x8x16xf32>, vector<2x8x16xf32>, vector<2x8x16xf32>, vector<2x8x16xf32> -> vector<2x8x64xf32>
    %321 = vector.shape_cast %320 : vector<2x8x64xf32> to vector<16x64xf32>
    %322 = arith.truncf %321 : vector<16x64xf32> to vector<16x64xbf16>
    %cst_128 = arith.constant dense<0.000000e+00> : vector<16x64xf32>
    %323 = tpu.matmul %322, %223, %cst_128 {dimension_numbers = #tpu.dot_dimension_numbers<[1], [0], [0], [1], [0, 0, 1, 1], [], []>} : vector<16x64xbf16>, vector<64x64xbf16>, vector<16x64xf32> -> vector<16x64xf32>
    %324 = vector.broadcast %225 : vector<1x64xf32> to vector<16x64xf32>
    %325 = arith.addf %323, %324 : vector<16x64xf32>
    %326 = vector.shape_cast %325 : vector<16x64xf32> to vector<2x8x64xf32>
    %327 = arith.addf %326, %217 : vector<2x8x64xf32>
    %cst_129 = arith.constant dense<0.000000e+00> : vector<2x8xf32>
    %328 = vector.multi_reduction <add>, %327, %cst_129 [2] : vector<2x8x64xf32> to vector<2x8xf32>
    %329 = vector.shape_cast %328 : vector<2x8xf32> to vector<2x8x1xf32>
    %cst_130 = arith.constant 6.400000e+01 : f32
    %330 = vector.broadcast %cst_130 : f32 to vector<2x8x1xf32>
    %331 = arith.divf %329, %330 : vector<2x8x1xf32>
    %332 = vector.broadcast %331 : vector<2x8x1xf32> to vector<2x8x64xf32>
    %333 = arith.subf %327, %332 : vector<2x8x64xf32>
    %334 = arith.mulf %333, %333 : vector<2x8x64xf32>
    %cst_131 = arith.constant dense<0.000000e+00> : vector<2x8xf32>
    %335 = vector.multi_reduction <add>, %334, %cst_131 [2] : vector<2x8x64xf32> to vector<2x8xf32>
    %336 = vector.shape_cast %335 : vector<2x8xf32> to vector<2x8x1xf32>
    %cst_132 = arith.constant 6.400000e+01 : f32
    %337 = vector.broadcast %cst_132 : f32 to vector<2x8x1xf32>
    %338 = arith.divf %336, %337 : vector<2x8x1xf32>
    %cst_133 = arith.constant 9.99999996E-13 : f32
    %339 = vector.broadcast %cst_133 : f32 to vector<2x8x1xf32>
    %340 = arith.addf %338, %339 : vector<2x8x1xf32>
    %341 = math.rsqrt %340 : vector<2x8x1xf32>
    %342 = vector.broadcast %341 : vector<2x8x1xf32> to vector<2x8x64xf32>
    %343 = arith.mulf %333, %342 : vector<2x8x64xf32>
    %344 = vector.shape_cast %227 : vector<1x64xf32> to vector<1x1x64xf32>
    %345 = vector.broadcast %344 : vector<1x1x64xf32> to vector<2x8x64xf32>
    %346 = arith.mulf %343, %345 : vector<2x8x64xf32>
    %347 = vector.shape_cast %229 : vector<1x64xf32> to vector<1x1x64xf32>
    %348 = vector.broadcast %347 : vector<1x1x64xf32> to vector<2x8x64xf32>
    %349 = arith.addf %346, %348 : vector<2x8x64xf32>
    %c1_134 = arith.constant 1 : index
    %c0_135 = arith.constant 0 : index
    %c0_136 = arith.constant 0 : index
    %350 = vector.load %arg10[%c1_134, %c0_135, %c0_136] : memref<2x64x128xbf16, #tpu.memory_space<vmem>>, vector<1x64x128xbf16>
    %351 = vector.shape_cast %350 : vector<1x64x128xbf16> to vector<64x128xbf16>
    %c1_137 = arith.constant 1 : index
    %c0_138 = arith.constant 0 : index
    %c0_139 = arith.constant 0 : index
    %352 = vector.load %arg11[%c1_137, %c0_138, %c0_139] : memref<2x1x128xf32, #tpu.memory_space<vmem>>, vector<1x1x128xf32>
    %353 = vector.shape_cast %352 : vector<1x1x128xf32> to vector<1x128xf32>
    %c1_140 = arith.constant 1 : index
    %c0_141 = arith.constant 0 : index
    %c0_142 = arith.constant 0 : index
    %354 = vector.load %arg12[%c1_140, %c0_141, %c0_142] : memref<2x128x64xbf16, #tpu.memory_space<vmem>>, vector<1x128x64xbf16>
    %355 = vector.shape_cast %354 : vector<1x128x64xbf16> to vector<128x64xbf16>
    %c1_143 = arith.constant 1 : index
    %c0_144 = arith.constant 0 : index
    %c0_145 = arith.constant 0 : index
    %356 = vector.load %arg13[%c1_143, %c0_144, %c0_145] : memref<2x1x64xf32, #tpu.memory_space<vmem>>, vector<1x1x64xf32>
    %357 = vector.shape_cast %356 : vector<1x1x64xf32> to vector<1x64xf32>
    %c1_146 = arith.constant 1 : index
    %c0_147 = arith.constant 0 : index
    %c0_148 = arith.constant 0 : index
    %358 = vector.load %arg14[%c1_146, %c0_147, %c0_148] : memref<2x1x64xf32, #tpu.memory_space<vmem>>, vector<1x1x64xf32>
    %359 = vector.shape_cast %358 : vector<1x1x64xf32> to vector<1x64xf32>
    %c1_149 = arith.constant 1 : index
    %c0_150 = arith.constant 0 : index
    %c0_151 = arith.constant 0 : index
    %360 = vector.load %arg15[%c1_149, %c0_150, %c0_151] : memref<2x1x64xf32, #tpu.memory_space<vmem>>, vector<1x1x64xf32>
    %361 = vector.shape_cast %360 : vector<1x1x64xf32> to vector<1x64xf32>
    %362 = vector.shape_cast %349 : vector<2x8x64xf32> to vector<16x64xf32>
    %363 = arith.truncf %362 : vector<16x64xf32> to vector<16x64xbf16>
    %cst_152 = arith.constant dense<0.000000e+00> : vector<16x128xf32>
    %364 = tpu.matmul %363, %351, %cst_152 {dimension_numbers = #tpu.dot_dimension_numbers<[1], [0], [0], [1], [0, 0, 1, 1], [], []>} : vector<16x64xbf16>, vector<64x128xbf16>, vector<16x128xf32> -> vector<16x128xf32>
    %365 = vector.broadcast %353 : vector<1x128xf32> to vector<16x128xf32>
    %366 = arith.addf %364, %365 : vector<16x128xf32>
    %367 = vector.shape_cast %366 : vector<16x128xf32> to vector<2x8x128xf32>
    %368 = arith.mulf %367, %367 : vector<2x8x128xf32>
    %369 = arith.mulf %367, %368 : vector<2x8x128xf32>
    %cst_153 = arith.constant 4.471500e-02 : f32
    %370 = vector.broadcast %cst_153 : f32 to vector<2x8x128xf32>
    %371 = arith.mulf %370, %369 : vector<2x8x128xf32>
    %372 = arith.addf %367, %371 : vector<2x8x128xf32>
    %cst_154 = arith.constant 0.797884583 : f32
    %373 = vector.broadcast %cst_154 : f32 to vector<2x8x128xf32>
    %374 = arith.mulf %373, %372 : vector<2x8x128xf32>
    %375 = math.tanh %374 : vector<2x8x128xf32>
    %cst_155 = arith.constant 1.000000e+00 : f32
    %376 = vector.broadcast %cst_155 : f32 to vector<2x8x128xf32>
    %377 = arith.addf %376, %375 : vector<2x8x128xf32>
    %cst_156 = arith.constant 5.000000e-01 : f32
    %378 = vector.broadcast %cst_156 : f32 to vector<2x8x128xf32>
    %379 = arith.mulf %378, %377 : vector<2x8x128xf32>
    %380 = arith.mulf %367, %379 : vector<2x8x128xf32>
    %381 = vector.shape_cast %380 : vector<2x8x128xf32> to vector<16x128xf32>
    %382 = arith.truncf %381 : vector<16x128xf32> to vector<16x128xbf16>
    %cst_157 = arith.constant dense<0.000000e+00> : vector<16x64xf32>
    %383 = tpu.matmul %382, %355, %cst_157 {dimension_numbers = #tpu.dot_dimension_numbers<[1], [0], [0], [1], [0, 0, 1, 1], [], []>} : vector<16x128xbf16>, vector<128x64xbf16>, vector<16x64xf32> -> vector<16x64xf32>
    %384 = vector.broadcast %357 : vector<1x64xf32> to vector<16x64xf32>
    %385 = arith.addf %383, %384 : vector<16x64xf32>
    %386 = vector.shape_cast %385 : vector<16x64xf32> to vector<2x8x64xf32>
    %387 = arith.addf %386, %349 : vector<2x8x64xf32>
    %cst_158 = arith.constant dense<0.000000e+00> : vector<2x8xf32>
    %388 = vector.multi_reduction <add>, %387, %cst_158 [2] : vector<2x8x64xf32> to vector<2x8xf32>
    %389 = vector.shape_cast %388 : vector<2x8xf32> to vector<2x8x1xf32>
    %cst_159 = arith.constant 6.400000e+01 : f32
    %390 = vector.broadcast %cst_159 : f32 to vector<2x8x1xf32>
    %391 = arith.divf %389, %390 : vector<2x8x1xf32>
    %392 = vector.broadcast %391 : vector<2x8x1xf32> to vector<2x8x64xf32>
    %393 = arith.subf %387, %392 : vector<2x8x64xf32>
    %394 = arith.mulf %393, %393 : vector<2x8x64xf32>
    %cst_160 = arith.constant dense<0.000000e+00> : vector<2x8xf32>
    %395 = vector.multi_reduction <add>, %394, %cst_160 [2] : vector<2x8x64xf32> to vector<2x8xf32>
    %396 = vector.shape_cast %395 : vector<2x8xf32> to vector<2x8x1xf32>
    %cst_161 = arith.constant 6.400000e+01 : f32
    %397 = vector.broadcast %cst_161 : f32 to vector<2x8x1xf32>
    %398 = arith.divf %396, %397 : vector<2x8x1xf32>
    %cst_162 = arith.constant 9.99999996E-13 : f32
    %399 = vector.broadcast %cst_162 : f32 to vector<2x8x1xf32>
    %400 = arith.addf %398, %399 : vector<2x8x1xf32>
    %401 = math.rsqrt %400 : vector<2x8x1xf32>
    %402 = vector.broadcast %401 : vector<2x8x1xf32> to vector<2x8x64xf32>
    %403 = arith.mulf %393, %402 : vector<2x8x64xf32>
    %404 = vector.shape_cast %359 : vector<1x64xf32> to vector<1x1x64xf32>
    %405 = vector.broadcast %404 : vector<1x1x64xf32> to vector<2x8x64xf32>
    %406 = arith.mulf %403, %405 : vector<2x8x64xf32>
    %407 = vector.shape_cast %361 : vector<1x64xf32> to vector<1x1x64xf32>
    %408 = vector.broadcast %407 : vector<1x1x64xf32> to vector<2x8x64xf32>
    %409 = arith.addf %406, %408 : vector<2x8x64xf32>
    %c0_163 = arith.constant 0 : index
    %c0_164 = arith.constant 0 : index
    %c0_165 = arith.constant 0 : index
    %410 = vector.load %arg16[%c0_163, %c0_164, %c0_165] : memref<2x8x64xf32, #tpu.memory_space<vmem>>, vector<2x8x64xf32>
    tpu.vector_store %arg16[%c0_163, %c0_164, %c0_165], %409 {strides = array<i32>} : memref<2x8x64xf32, #tpu.memory_space<vmem>>, vector<2x8x64xf32>,
    return
  }
}

</mosaic_0001>

<bundles_post_ra>
// kernel: _language_impl.1
= control target key start
LH: loop header
LB: loop body
LE: loop exit
PB: predicated region body
PF: predicated region fallthrough
CT: control target
= control target key end

     0   :  { %s3241_s0 = inlined_call_operand.vmem [shape: f32[2,8,64], index: 0, kind: input, shape index: {}]   ;;  %s3242_s1 = inlined_call_operand.vmem [shape: f32[2,8], index: 1, kind: input, shape index: {}]   ;;  %s3243_s2 = inlined_call_operand.vmem [shape: f32[1,64], index: 2, kind: input, shape index: {}]   ;;  %s3244_s3 = inlined_call_operand.vmem [shape: f32[1,64], index: 3, kind: input, shape index: {}]   ;;  %s3245_s4 = inlined_call_operand.hbm [shape: bf16[2,64,192], index: 4, kind: input, shape index: {}]   ;;  %s3246_s5 = inlined_call_operand.vmem [shape: f32[2,1,192], index: 5, kind: input, shape index: {}]   ;;  %s3247_s6 = inlined_call_operand.hbm [shape: bf16[2,64,64], index: 6, kind: input, shape index: {}]   ;;  %s3248_s7 = inlined_call_operand.vmem [shape: f32[2,1,64], index: 7, kind: input, shape index: {}, may-alias: {7,9,13,15}]   ;;  %s3249_s8 = inlined_call_operand.vmem [shape: f32[2,1,64], index: 8, kind: input, shape index: {}, may-alias: {8,14}]   ;;  %s3250_s9 = inlined_call_operand.vmem [shape: f32[2,1,64], index: 9, kind: input, shape index: {}, may-alias: {7,9,13,15}]   ;;  %s3251_s10 = inlined_call_operand.vmem [shape: bf16[2,64,128], index: 10, kind: input, shape index: {}]   ;;  %s3252_s11 = inlined_call_operand.vmem [shape: f32[2,1,128], index: 11, kind: input, shape index: {}]   ;;  %s3253_s12 = inlined_call_operand.vmem [shape: bf16[2,128,64], index: 12, kind: input, shape index: {}]   ;;  %s3254_s13 = inlined_call_operand.vmem [shape: f32[2,1,64], index: 13, kind: input, shape index: {}, may-alias: {7,9,13,15}]   ;;  %s3255_s14 = inlined_call_operand.vmem [shape: f32[2,1,64], index: 14, kind: input, shape index: {}, may-alias: {8,14}]   ;;  %s3256_s15 = inlined_call_operand.vmem [shape: f32[2,1,64], index: 15, kind: input, shape index: {}, may-alias: {7,9,13,15}]   ;;  %s3257_s16 = inlined_call_operand.hbm [shape: f32[2,8,64], index: 16, kind: output, shape index: {}]  }
   0x1   :  { %3259 = sst [smem:[#allocation11_spill]] %s3241_s0 }
   0x2   :  { %21 = vsyncpa [#allocation3], 0 }
   0x3   :  { %22 = vsyncpa [#allocation6], 0 }
   0x4   :  { %23 = vsyncpa [#allocation4], 0  ;;  %s36_s23 = sshll.u32 %s3245_s4, 4  ;;  %s2713_s24 = smov [#allocation2]   ;;  %s37_s23 = int_to_ptr.hbm [resolvable:$true] %s36_s23 }
   0x5   :  { %s38_s25 = sshll.u32 %s2713_s24, 4  ;;  %s51_s28 = sshll.u32 %s3247_s6, 4  ;;  %s39_s25 = int_to_ptr.vmem [resolvable:$true] %s38_s25  ;;  %s52_s28 = int_to_ptr.hbm [resolvable:$true] %s51_s28 }
   0x6   :  { %s2714_s29 = smov 128   ;;  %s2715_s30 = smov 8  }
   0x7   :  { %44 = dma.hbm_to_vmem [thread:$0]  %s37_s23, 2048, %s39_s25, [#allocation3], %s2714_s29, %s2714_s29, %s2715_s30  }
   0x8   :  { %s2716_s0 = smov [#allocation5]   ;;  %s2717_s18 = smov 64  }
   0x9   :  { %s53_s17 = sshll.u32 %s2716_s0, 4  ;;  %s2718_s4 = smov 4   ;;  %s54_s17 = int_to_ptr.vmem [resolvable:$true] %s53_s17 }
   0xa   :  { %59 = dma.hbm_to_vmem [thread:$0]  %s52_s28, 1024, %s54_s17, [#allocation6], %s2717_s18, %s2717_s18, %s2718_s4  }
   0xb   :  { %2707 = dma.done.wait [#allocation3], 2048  }
   0xc   :  { %2708 = vsyncadd [#allocation3], 4294965248 }
   0xd   :  { %2709 = dma.done.wait [#allocation6], 1024  }
   0xe   :  { %2710 = vsyncadd [#allocation6], 4294966272  ;;  %vm91_vm0 = vcmask 523264   ;;  %s3260_s20 = sld [smem:[#allocation11_spill]]  ;;  %v2719_v4 = vmov 64.0   ;;  %s2721_s28 = smov 112  }
   0xf   :  { %2541 = vrcp.f32 %v2719_v4  ;;  %v2148_v21 = vld [vmem:[#allocation2 + $0x30] sm:$0xf]  ;;  %v2410_v22 = vld [vmem:[#allocation2 + $0x34] sm:$0xf0]  ;;  %v2409_v23 = vld [vmem:[#allocation2 + $0x34] sm:$0xf] }
  0x10   :  { %v2149_v24 = vor.u32 %v2410_v22, %v2148_v21  ;;  %v2150_v25 = vld [vmem:[#allocation2 + $0x38] sm:$0xf0]  ;;  %v2140_v27 = vld [vmem:[#allocation2 + $0x20] sm:$0xf]  ;;  %v2408_v28 = vld [vmem:[#allocation2 + $0x24] sm:$0xf0] }
  0x11   :  { %v2153_v26 = vor.u32 %v2409_v23, %v2150_v25  ;;  %v2407_v29 = vld [vmem:[#allocation2 + $0x24] sm:$0xf]  ;;  %v2141_v30 = vor.u32 %v2408_v28, %v2140_v27  ;;  %v2142_v31 = vld [vmem:[#allocation2 + $0x28] sm:$0xf0]  ;;  %v2132_v33 = vld [vmem:[#allocation2 + $0x10] sm:$0xf] }
  0x12   :  { %227 = vmatpush.bf16.msra.mxu0 %v2149_v24  ;;  %v2145_v32 = vor.u32 %v2407_v29, %v2142_v31  ;;  %v2406_v34 = vld [vmem:[#allocation2 + $0x14] sm:$0xf0]  ;;  %v2405_v35 = vld [vmem:[#allocation2 + $0x14] sm:$0xf]  ;;  %v2134_v37 = vld [vmem:[#allocation2 + $0x18] sm:$0xf0] }
  0x13   :  { %241 = vmatpush.bf16.msra.mxu1 %v2153_v26  ;;  %v2133_v36 = vor.u32 %v2406_v34, %v2132_v33  ;;  %v2137_v38 = vor.u32 %v2405_v35, %v2134_v37  ;;  %v2124_v39 = vld [vmem:[#allocation2] sm:$0xf]  ;;  %v2404_v40 = vld [vmem:[#allocation2 + $0x4] sm:$0xf0]  ;;  %v2403_v41 = vld [vmem:[#allocation2 + $0x4] sm:$0xf] }
  0x14   :  { %v87_v0 = vld [vmem:[%s3260_s20] sm:$0xff]  ;;  %v88_v2 = vld [vmem:[%s3260_s20 + $0x8] sm:$0xff]  ;;  %v2125_v43 = vor.u32 %v2404_v40, %v2124_v39  ;;  %s2722_s0 = smov 32   ;;  %s2723_s17 = smov 96   ;;  %vm268_vm8 = vcmask 130048   ;;  %vm322_vm9 = vcmask 64512  }
  0x15   :  { %v92_v1 = vsel %vm91_vm0, %v87_v0, 0.0  ;;  %v95_v3 = vsel %vm91_vm0, %v88_v2, 0.0  ;;  %v2542_v5 = vpop.eup %2541  ;;  %v2126_v44 = vld [vmem:[#allocation2 + $0x8] sm:$0xf0]  ;;  %s2724_s4 = smov 80   ;;  %s2725_s20 = smov 16  }
  0x16   :  { %93 = vadd.xlane.f32.xlu0 %v92_v1  ;;  %v99_v6 = vmul.f32 64.0, %v2542_v5  ;;  %vm103_vm1 = vweird.f32 %v2542_v5  ;;  %228 = vmatpush.bf16.msra.mxu0 %v2141_v30  ;;  %v2129_v46 = vor.u32 %v2403_v41, %v2126_v44  ;;  %v153_v31 = vld [vmem:[%s3242_s1] sm:$0x3]  ;;  %vm809_vm10 = vcmask 261120   ;;  %s2108_s21 = sshll.u32 %s3257_s16, 4  ;;  %s2109_s21 = int_to_ptr.hbm [resolvable:$true] %s2108_s21 }
  0x17   :  { %242 = vmatpush.bf16.msra.mxu1 %v2145_v32  ;;  %v2156_v32 = vadd.f32 -1.0, %v153_v31  ;;  %vm812_vm11 = vcmask 392192  }
  0x18   :  { %v100_v7 = vsub.f32 1.0, %v99_v6 }
  0x19   :  { %v253_v33 = vrot.slane %v2156_v32, 1  ;;  %v255_v40 = vmul.f32 1e+09, %v2156_v32 }
  0x1a   :  { %v101_v8 = vmul.f32 %v2542_v5, %v100_v7  ;;  %229 = vmatpush.bf16.msra.mxu0 %v2133_v36 }
  0x1b   :  { %243 = vmatpush.bf16.msra.mxu1 %v2137_v38  ;;  %v256_v35 = vmul.f32 1e+09, %v253_v33  ;;  %v2905_v41 = vperm.slane %v255_v40, 0 }
  0x1c   :  { %v102_v9 = vadd.f32 %v2542_v5, %v101_v8 }
  0x1d   :  { %v2898_v36 = vperm.slane %v256_v35, 0 }
  0x1e   :  { %96 = vadd.xlane.f32.xlu0 %v95_v3  ;;  %v2831_v10 = vsel %vm103_vm1, %v2542_v5, %v102_v9  ;;  %230 = vmatpush.bf16.msra.mxu0 %v2125_v43  ;;  %v2526_v5 = vld [vmem:[%s3244_s3] ss:$0 sm:$0xff]  ;;  %s2720_s3 = smov 48  }
  0x1f   :  { %244 = vmatpush.bf16.msra.mxu1 %v2129_v46 }
  0x89   :  { %v94_v11 = vpop.xlane.xlu0 %93 }
  0x8a   :  { %v105_v12 = vmul.f32 %v2831_v10, %v94_v11  ;;  %v162_v11 = vld [vmem:[%s3246_s5] sm:$0x3] }
  0x8c   :  { %v2834_v13 = vsub.f32 %v87_v0, %v105_v12  ;;  %v2525_v0 = vld [vmem:[%s3243_s2] ss:$0 sm:$0xff]  ;;  %v176_v12 = vperm.slane %v162_v11, 0 }
  0x8e   :  { %v109_v14 = vmul.f32 %v2834_v13, %v2834_v13 }
  0x90   :  { %v111_v15 = vsel %vm91_vm0, %v109_v14, 0.0 }
  0x91   :  { %112 = vadd.xlane.f32.xlu1 %v111_v15  ;;  %v97_v16 = vpop.xlane.xlu0 %96 }
  0x92   :  { %v106_v17 = vmul.f32 %v2831_v10, %v97_v16 }
  0x94   :  { %v2840_v18 = vsub.f32 %v88_v2, %v106_v17 }
  0x96   :  { %v110_v19 = vmul.f32 %v2840_v18, %v2840_v18 }
  0x98   :  { %v114_v20 = vsel %vm91_vm0, %v110_v19, 0.0 }
  0x99   :  { %115 = vadd.xlane.f32.xlu1 %v114_v20 }
 0x104   :  { %v113_v42 = vpop.xlane.xlu1 %112 }
 0x105   :  { %v117_v45 = vmul.f32 %v113_v42, %v2831_v10 }
 0x107   :  { %v119_v47 = vadd.f32 1e-12, %v117_v45 }
 0x109   :  { %2543 = vrsqrt.f32 %v119_v47  ;;  %vm127_vm3 = vweird.f32 %v119_v47 }
 0x10c   :  { %v116_v48 = vpop.xlane.xlu1 %115 }
 0x10d   :  { %v118_v49 = vmul.f32 %v116_v48, %v2831_v10 }
 0x10f   :  { %v2544_v50 = vpop.eup %2543  ;;  %v120_v51 = vadd.f32 1e-12, %v118_v49 }
 0x110   :  { %v122_v52 = vmul.f32 %v2544_v50, %v119_v47  ;;  %vm128_vm2 = vweird.f32 %v2544_v50 }
 0x111   :  { %2545 = vrsqrt.f32 %v120_v51  ;;  %vm129_vm4 = vmor %vm127_vm3, %vm128_vm2  ;;  %vm137_vm6 = vweird.f32 %v120_v51 }
 0x112   :  { %v123_v53 = vmul.f32 %v2544_v50, %v122_v52 }
 0x114   :  { %v124_v54 = vmul.f32 0.5, %v123_v53 }
 0x116   :  { %v125_v55 = vsub.f32 1.5, %v124_v54 }
 0x117   :  { %v2546_v56 = vpop.eup %2545 }
 0x118   :  { %v126_v57 = vmul.f32 %v2544_v50, %v125_v55  ;;  %v132_v58 = vmul.f32 %v2546_v56, %v120_v51  ;;  %vm138_vm5 = vweird.f32 %v2546_v56 }
 0x119   :  { %vm139_vm7 = vmor %vm137_vm6, %vm138_vm5 }
 0x11a   :  { %v133_v59 = vmul.f32 %v2546_v56, %v132_v58  ;;  %v130_v60 = vsel %vm129_vm4, %v2544_v50, %v126_v57 }
 0x11b   :  { %v141_v63 = vmul.f32 %v130_v60, %v2834_v13  ;;  %v177_v13 = vperm.slane %v162_v11, 1 }
 0x11c   :  { %v134_v61 = vmul.f32 0.5, %v133_v59 }
 0x11d   :  { %v146_v4 = vmul.f32 %v2525_v0, %v141_v63 }
 0x11e   :  { %v135_v62 = vsub.f32 1.5, %v134_v61 }
 0x11f   :  { %v2855_v7 = vadd.f32 %v2526_v5, %v146_v4 }
 0x120   :  { %v136_v1 = vmul.f32 %v2546_v56, %v135_v62 }
 0x122   :  { %v140_v2 = vsel %vm139_vm7, %v2546_v56, %v136_v1 }
 0x123   :  { %v142_v3 = vmul.f32 %v140_v2, %v2840_v18 }
 0x125   :  { %v147_v6 = vmul.f32 %v2525_v0, %v142_v3 }
 0x127   :  { %v2857_v8 = vadd.f32 %v2526_v5, %v147_v6 }
 0x129   :  { %v174_v9 = vpack.c.bf16 %v2857_v8, %v2855_v7 }
 0x12b   :  { %2154 = vmatmul.msk.bf16.vlgmr.msra.gmra.mxu0 %vm91_vm0, %v174_v9  ;;  %2155 = vmatmul.msk.bf16.vlgmr.msra.gmra.mxu1 %vm91_vm0, %v174_v9 }
 0x1a8   :  { %v232_v14 = vpop.f32.mrf.mxu0  ;;  %v246_v15 = vpop.f32.mrf.mxu1 }
 0x1a9   :  { %v2866_v16 = vadd.f32 %v232_v14, %v176_v12  ;;  %v2868_v17 = vadd.f32 %v246_v15, %v177_v13 }
 0x1ab   :  { %363 = vmatpush.msra.mxu2 %v2868_v17  ;;  %266 = vrot.lane.b32.xlu2 %v2866_v16, %s2717_s18  ;;  %v257_v21 = vmul.f32 0.25, %v2866_v16 }
 0x1b0   :  { %v234_v18 = vpop.f32.mrf.mxu0  ;;  %v248_v23 = vpop.f32.mrf.mxu1 }
 0x1b1   :  { %v235_v19 = vadd.f32 %v234_v18, %v176_v12  ;;  %v2886_v24 = vadd.f32 %v248_v23, %v177_v13 }
 0x1b3   :  { %421 = vrot.lane.b32.xlu1 %v235_v19, %s2720_s3  ;;  %295 = vrot.lane.b32.xlu2 %v235_v19, %s2717_s18  ;;  %v258_v20 = vmul.f32 0.25, %v235_v19 }
 0x1bb   :  { %393 = vrot.lane.b32.xlu2 %v2866_v16, %s2720_s3 }
 0x1c3   :  { %419 = vrot.lane.b32.xlu2 %v258_v20, %s2721_s28 }
 0x1cb   :  { %525 = vrot.lane.b32.xlu2 %v2866_v16, %s2722_s0 }
 0x1d3   :  { %553 = vrot.lane.b32.xlu2 %v235_v19, %s2722_s0 }
 0x1db   :  { %551 = vrot.lane.b32.xlu2 %v258_v20, %s2723_s17 }
 0x1e3   :  { %653 = vrot.lane.b32.xlu2 %v257_v21, %s2724_s4 }
 0x205   :  { %v267_v22 = vpop.permute.xlu2 %266 }
 0x206   :  { %2157 = vmatpush.xpose.msk.msra.mxu3 %vm268_vm8, %v267_v22 }
 0x209   :  { %2158 = vmatmul.msk.f32.vlgmr.msra.gmra.mxu3 %vm268_vm8, %v257_v21 }
 0x20d   :  { %v296_v25 = vpop.permute.xlu2 %295 }
 0x20e   :  { %2159 = vmatpush.xpose.msk.msrb.mxu3 %vm268_vm8, %v296_v25 }
 0x211   :  { %2160 = vmatmul.msk.f32.vlgmr.msrb.gmra.mxu3 %vm268_vm8, %v258_v20 }
 0x212   :  { %386 = vmatpush.msra.mxu3 %v2886_v24 }
 0x215   :  { %v394_v26 = vpop.permute.xlu2 %393 }
 0x216   :  { %2163 = vmatpush.xpose.msk.msrb.mxu3 %vm268_vm8, %v394_v26 }
 0x21d   :  { %v420_v27 = vpop.permute.xlu2 %419 }
 0x225   :  { %v526_v28 = vpop.permute.xlu2 %525  ;;  %v422_v52 = vpop.permute.xlu1 %421 }
 0x226   :  { %2169 = vmatpush.xpose.msk.msrb.mxu0 %vm268_vm8, %v526_v28 }
 0x22d   :  { %v554_v29 = vpop.permute.xlu2 %553 }
 0x22e   :  { %2171 = vmatpush.xpose.msk.msrb.mxu1 %vm268_vm8, %v554_v29 }
 0x235   :  { %v552_v30 = vpop.permute.xlu2 %551 }
 0x236   :  { %2172 = vmatmul.msk.f32.vlgmr.msrb.gmra.mxu1 %vm268_vm8, %v552_v30 }
 0x23d   :  { %v654_v59 = vpop.permute.xlu2 %653 }
 0x28c   :  { %v291_v34 = vpop.f32.mrf.mxu3 }
 0x28d   :  { %v292_v42 = vadd.f32 %v291_v34, %v2905_v41 }
 0x28f   :  { %v323_v43 = vsel %vm322_vm9, %v292_v42, -inf }
 0x294   :  { %v319_v37 = vpop.f32.mrf.mxu3 }
 0x295   :  { %v320_v38 = vadd.f32 %v319_v37, %v2898_v36 }
 0x297   :  { %v326_v39 = vsel %vm322_vm9, %v320_v38, -inf }
 0x298   :  { %327 = vmax.xlane.f32.xlu0 %v326_v39 }
 0x2ac   :  { %391 = vrot.lane.b32.xlu0 %v257_v21, %s2721_s28 }
 0x2b3   :  { %v576_v1 = vpop.f32.mrf.mxu1 }
 0x2b4   :  { %523 = vrot.lane.b32.xlu0 %v257_v21, %s2723_s17  ;;  %v577_v6 = vadd.f32 %v576_v1, %v2898_v36 }
 0x2b6   :  { %v582_v18 = vsel %vm322_vm9, %v577_v6, -inf }
 0x2bc   :  { %683 = vrot.lane.b32.xlu0 %v235_v19, %s2725_s20 }
 0x2e6   :  { %324 = vmax.xlane.f32.xlu0 %v323_v43 }
 0x30b   :  { %v328_v44 = vpop.xlane.xlu0 %327 }
 0x30c   :  { %v330_v45 = vsub.f32 %v320_v38, %v328_v44 }
 0x30e   :  { %v333_v46 = vmul.f32 1.442695, %v330_v45 }
 0x310   :  { %2547 = vpow2.f32 %v333_v46 }
 0x316   :  { %v2548_v47 = vpop.eup %2547 }
 0x317   :  { %v338_v48 = vsel %vm322_vm9, %v2548_v47, 0.0 }
 0x318   :  { %339 = vadd.xlane.f32.xlu1 %v338_v48 }
 0x31e   :  { %v392_v49 = vpop.permute.xlu0 %391 }
 0x326   :  { %v524_v50 = vpop.permute.xlu0 %523 }
 0x327   :  { %2170 = vmatmul.msk.f32.vlgmr.msrb.gmra.mxu0 %vm268_vm8, %v524_v50 }
 0x32e   :  { %v684_v51 = vpop.permute.xlu0 %683 }
 0x32f   :  { %2177 = vmatpush.xpose.msk.msra.mxu1 %vm268_vm8, %v684_v51 }
 0x331   :  { %655 = vrot.lane.b32.xlu1 %v2866_v16, %s2725_s20 }
 0x339   :  { %681 = vrot.lane.b32.xlu1 %v258_v20, %s2724_s4 }
 0x359   :  { %v325_v63 = vpop.xlane.xlu0 %324 }
 0x35a   :  { %v329_v3 = vsub.f32 %v292_v42, %v325_v63 }
 0x35c   :  { %v331_v5 = vmul.f32 1.442695, %v329_v3 }
 0x38b   :  { %v340_v53 = vpop.xlane.xlu1 %339 }
 0x38c   :  { %2549 = vrcp.f32 %v340_v53 }
 0x38d   :  { %2551 = vpow2.f32 %v331_v5 }
 0x392   :  { %v2550_v54 = vpop.eup %2549 }
 0x393   :  { %v344_v55 = vmul.f32 %v2550_v54, %v2548_v47  ;;  %v2552_v23 = vpop.eup %2551 }
 0x394   :  { %v335_v26 = vsel %vm322_vm9, %v2552_v23, 0.0 }
 0x395   :  { %2162 = vmatmul.msk.f32.vlgmr.msra.gmra.mxu3 %vm322_vm9, %v344_v55 }
 0x396   :  { %2165 = vmatpush.xpose.msk.msra.mxu3 %vm268_vm8, %v422_v52 }
 0x39d   :  { %2164 = vmatmul.msk.f32.vlgmr.msrb.gmra.mxu3 %vm268_vm8, %v392_v49 }
 0x3a3   :  { %v656_v56 = vpop.permute.xlu1 %655 }
 0x3a4   :  { %v548_v57 = vpop.f32.mrf.mxu0  ;;  %2175 = vmatpush.xpose.msk.msra.mxu0 %vm268_vm8, %v656_v56 }
 0x3a5   :  { %v549_v58 = vadd.f32 %v548_v57, %v2905_v41  ;;  %2166 = vmatmul.msk.f32.vlgmr.msra.gmra.mxu3 %vm268_vm8, %v420_v27 }
 0x3a7   :  { %2176 = vmatmul.msk.f32.vlgmr.msra.gmra.mxu0 %vm268_vm8, %v654_v59  ;;  %v579_v60 = vsel %vm322_vm9, %v549_v58, -inf  ;;  %v2465_v59 = vpack.i.bf16 %v2886_v24, %v2868_v17 }
 0x3a8   :  { %580 = vmax.xlane.f32.xlu0 %v579_v60 }
 0x3ab   :  { %v682_v61 = vpop.permute.xlu1 %681 }
 0x3ac   :  { %2178 = vmatmul.msk.f32.vlgmr.msra.gmra.mxu1 %vm268_vm8, %v682_v61 }
 0x418   :  { %v2924_v62 = vpop.f32.mrf.mxu3 }
 0x41b   :  { %v581_v9 = vpop.xlane.xlu0 %580 }
 0x41c   :  { %v585_v14 = vsub.f32 %v549_v58, %v581_v9 }
 0x41e   :  { %v587_v21 = vmul.f32 1.442695, %v585_v14 }
 0x420   :  { %v416_v0 = vpop.f32.mrf.mxu3  ;;  %2553 = vpow2.f32 %v587_v21 }
 0x421   :  { %v417_v2 = vadd.f32 %v416_v0, %v2905_v41 }
 0x423   :  { %v447_v4 = vsel %vm322_vm9, %v417_v2, -inf }
 0x424   :  { %448 = vmax.xlane.f32.xlu2 %v447_v4  ;;  %v678_v19 = vpop.f32.mrf.mxu0 }
 0x425   :  { %v679_v22 = vadd.f32 %v678_v19, %v2905_v41 }
 0x426   :  { %v2937_v27 = vpop.eup %2553 }
 0x427   :  { %v709_v25 = vsel %vm322_vm9, %v679_v22, -inf  ;;  %v591_v28 = vsel %vm322_vm9, %v2937_v27, 0.0 }
 0x428   :  { %v444_v11 = vpop.f32.mrf.mxu3 }
 0x429   :  { %v445_v12 = vadd.f32 %v444_v11, %v2898_v36  ;;  %v706_v13 = vpop.f32.mrf.mxu1 }
 0x42a   :  { %v707_v15 = vadd.f32 %v706_v13, %v2898_v36 }
 0x42b   :  { %v450_v16 = vsel %vm322_vm9, %v445_v12, -inf }
 0x42c   :  { %451 = vmax.xlane.f32.xlu1 %v450_v16  ;;  %583 = vmax.xlane.f32.xlu2 %v582_v18  ;;  %v712_v20 = vsel %vm322_vm9, %v707_v15, -inf }
 0x42d   :  { %713 = vmax.xlane.f32.xlu0 %v712_v20 }
 0x434   :  { %710 = vmax.xlane.f32.xlu1 %v709_v25  ;;  %336 = vadd.xlane.f32.xlu2 %v335_v26 }
 0x43c   :  { %592 = vadd.xlane.f32.xlu2 %v591_v28 }
 0x497   :  { %v449_v29 = vpop.xlane.xlu2 %448 }
 0x498   :  { %v453_v37 = vsub.f32 %v417_v2, %v449_v29 }
 0x49a   :  { %v455_v38 = vmul.f32 1.442695, %v453_v37 }
 0x49f   :  { %v452_v30 = vpop.xlane.xlu1 %451  ;;  %v584_v31 = vpop.xlane.xlu2 %583 }
 0x4a0   :  { %v454_v32 = vsub.f32 %v445_v12, %v452_v30  ;;  %v586_v33 = vsub.f32 %v577_v6, %v584_v31  ;;  %v714_v42 = vpop.xlane.xlu0 %713 }
 0x4a1   :  { %v716_v47 = vsub.f32 %v707_v15, %v714_v42  ;;  %v2411_v42 = vld [vmem:[#allocation5] sm:$0xff] }
 0x4a2   :  { %v457_v34 = vmul.f32 1.442695, %v454_v32  ;;  %v589_v35 = vmul.f32 1.442695, %v586_v33 }
 0x4a3   :  { %v719_v51 = vmul.f32 1.442695, %v716_v47 }
 0x4a4   :  { %2555 = vpow2.f32 %v457_v34 }
 0x4a5   :  { %2557 = vpow2.f32 %v589_v35 }
 0x4a7   :  { %v711_v39 = vpop.xlane.xlu1 %710  ;;  %v337_v40 = vpop.xlane.xlu2 %336 }
 0x4a8   :  { %v715_v43 = vsub.f32 %v679_v22, %v711_v39  ;;  %2559 = vrcp.f32 %v337_v40  ;;  %v2413_v39 = vld [vmem:[#allocation5 + $0x10] sm:$0xff]  ;;  %v2412_v40 = vld [vmem:[#allocation5 + $0x8] sm:$0xff] }
 0x4a9   :  { %2561 = vpow2.f32 %v455_v38  ;;  %v2414_v38 = vld [vmem:[#allocation5 + $0x18] sm:$0xff] }
 0x4aa   :  { %v2556_v44 = vpop.eup %2555  ;;  %v717_v45 = vmul.f32 1.442695, %v715_v43  ;;  %850 = vmatpush.bf16.msrb.mxu0 %v2414_v38  ;;  %v2528_v38 = vld [vmem:[%s3249_s8] ss:$0 sm:$0xff] }
 0x4ab   :  { %v2558_v46 = vpop.eup %2557  ;;  %v462_v48 = vsel %vm322_vm9, %v2556_v44, 0.0 }
 0x4ac   :  { %2563 = vpow2.f32 %v717_v45  ;;  %v594_v49 = vsel %vm322_vm9, %v2558_v46, 0.0  ;;  %463 = vadd.xlane.f32.xlu0 %v462_v48 }
 0x4ad   :  { %595 = vadd.xlane.f32.xlu1 %v594_v49  ;;  %2565 = vpow2.f32 %v719_v51 }
 0x4ae   :  { %v2560_v50 = vpop.eup %2559  ;;  %851 = vmatpush.bf16.msrb.mxu0 %v2413_v39 }
 0x4af   :  { %v343_v52 = vmul.f32 %v2560_v50, %v2552_v23  ;;  %v2562_v53 = vpop.eup %2561  ;;  %v593_v60 = vpop.xlane.xlu2 %592 }
 0x4b0   :  { %v459_v56 = vsel %vm322_vm9, %v2562_v53, 0.0 }
 0x4b1   :  { %2161 = vmatmul.msk.f32.vlgmr.msra.gmra.mxu2 %vm322_vm9, %v343_v52 }
 0x4b2   :  { %v2564_v54 = vpop.eup %2563  ;;  %852 = vmatpush.bf16.msrb.mxu0 %v2412_v40 }
 0x4b3   :  { %v721_v55 = vsel %vm322_vm9, %v2564_v54, 0.0  ;;  %v2566_v57 = vpop.eup %2565 }
 0x4b4   :  { %722 = vadd.xlane.f32.xlu2 %v721_v55  ;;  %v724_v58 = vsel %vm322_vm9, %v2566_v57, 0.0 }
 0x4b5   :  { %460 = vadd.xlane.f32.xlu1 %v459_v56 }
 0x4b6   :  { %853 = vmatpush.bf16.msrb.mxu0 %v2411_v42 }
 0x4bd   :  { %725 = vadd.xlane.f32.xlu1 %v724_v58 }
 0x4c0   :  { %2466 = vrot.lane.b32.xlu0 %v2465_v59, %s2721_s28 }
 0x4cc   :  { %2471 = vrot.lane.b32.xlu2 %v2465_v59, %s2723_s17 }
 0x4d6   :  { %2476 = vrot.lane.b32.xlu1 %v2465_v59, %s2724_s4  ;;  %v2527_v59 = vld [vmem:[%s3248_s7] ss:$0 sm:$0xff] }
 0x51f   :  { %v464_v63 = vpop.xlane.xlu0 %463 }
 0x520   :  { %v596_v61 = vpop.xlane.xlu1 %595  ;;  %2567 = vrcp.f32 %v464_v63 }
 0x526   :  { %v2568_v2 = vpop.eup %2567 }
 0x527   :  { %v723_v1 = vpop.xlane.xlu2 %722  ;;  %v468_v6 = vmul.f32 %v2568_v2, %v2556_v44 }
 0x528   :  { %v461_v0 = vpop.xlane.xlu1 %460 }
 0x529   :  { %2569 = vrcp.f32 %v461_v0 }
 0x52a   :  { %2571 = vrcp.f32 %v593_v60 }
 0x52b   :  { %2573 = vrcp.f32 %v596_v61 }
 0x52c   :  { %2575 = vrcp.f32 %v723_v1 }
 0x52f   :  { %v2570_v3 = vpop.eup %2569  ;;  %v2472_v4 = vpop.permute.xlu2 %2471 }
 0x530   :  { %v467_v9 = vmul.f32 %v2570_v3, %v2562_v53  ;;  %v2474_v11 = vunpack.i.h.bf16 %v2472_v4  ;;  %v2473_v12 = vunpack.i.l.bf16 %v2472_v4  ;;  %v2572_v13 = vpop.eup %2571  ;;  %v726_v18 = vpop.xlane.xlu1 %725 }
 0x531   :  { %v2574_v14 = vpop.eup %2573  ;;  %v599_v15 = vmul.f32 %v2572_v13, %v2937_v27  ;;  %2577 = vrcp.f32 %v726_v18 }
 0x532   :  { %v2467_v5 = vpop.permute.xlu0 %2466  ;;  %v600_v16 = vmul.f32 %v2574_v14, %v2558_v46  ;;  %v2576_v19 = vpop.eup %2575  ;;  %v2417_v14 = vld [vmem:[%s3251_s10 + $0x10] sm:$0xff] }
 0x533   :  { %v2469_v17 = vunpack.i.h.bf16 %v2467_v5  ;;  %v2468_v24 = vunpack.i.l.bf16 %v2467_v5  ;;  %v729_v25 = vmul.f32 %v2576_v19, %v2564_v54 }
 0x534   :  { %v365_v27 = vpop.f32.mrf.mxu2 }
 0x535   :  { %491 = vmatpush.msrb.mxu2 %v2468_v24  ;;  %518 = vmatpush.msrb.mxu3 %v2469_v17 }
 0x536   :  { %2167 = vmatmul.msk.f32.vlgmr.msrb.gmra.mxu2 %vm322_vm9, %v467_v9  ;;  %2168 = vmatmul.msk.f32.vlgmr.msrb.gmra.mxu3 %vm322_vm9, %v468_v6 }
 0x537   :  { %622 = vmatpush.msra.mxu2 %v2473_v12  ;;  %648 = vmatpush.msra.mxu3 %v2474_v11  ;;  %v2578_v20 = vpop.eup %2577 }
 0x538   :  { %v730_v26 = vmul.f32 %v2578_v20, %v2566_v57  ;;  %v2415_v20 = vld [vmem:[%s3251_s10] sm:$0xff] }
 0x53e   :  { %2173 = vmatmul.msk.f32.vlgmr.msra.gmra.mxu2 %vm322_vm9, %v599_v15  ;;  %2174 = vmatmul.msk.f32.vlgmr.msra.gmra.mxu3 %vm322_vm9, %v600_v16  ;;  %v2416_v15 = vld [vmem:[%s3251_s10 + $0x8] sm:$0xff] }
 0x548   :  { %v2477_v21 = vpop.permute.xlu1 %2476 }
 0x549   :  { %v2479_v22 = vunpack.i.h.bf16 %v2477_v21  ;;  %v2478_v23 = vunpack.i.l.bf16 %v2477_v21 }
 0x54b   :  { %752 = vmatpush.msrb.mxu2 %v2478_v23  ;;  %778 = vmatpush.msrb.mxu3 %v2479_v22 }
 0x54c   :  { %2179 = vmatmul.msk.f32.vlgmr.msrb.gmra.mxu2 %vm322_vm9, %v729_v25  ;;  %2180 = vmatmul.msk.f32.vlgmr.msrb.gmra.mxu3 %vm322_vm9, %v730_v26 }
 0x5b9   :  { %v493_v28 = vpop.f32.mrf.mxu2  ;;  %v520_v29 = vpop.f32.mrf.mxu3 }
 0x5ba   :  { %v2480_v30 = vpack.i.bf16 %v520_v29, %v493_v28 }
 0x5bc   :  { %2481 = vrot.lane.b32.xlu0 %v2480_v30, %s2725_s20 }
 0x5c1   :  { %v624_v31 = vpop.f32.mrf.mxu2  ;;  %v650_v32 = vpop.f32.mrf.mxu3 }
 0x5c2   :  { %v2485_v33 = vpack.i.bf16 %v650_v32, %v624_v31 }
 0x5c4   :  { %2486 = vrot.lane.b32.xlu0 %v2485_v33, %s2722_s0 }
 0x5cf   :  { %v754_v34 = vpop.f32.mrf.mxu2  ;;  %v780_v35 = vpop.f32.mrf.mxu3 }
 0x5d0   :  { %v2490_v37 = vpack.i.bf16 %v780_v35, %v754_v34 }
 0x5d2   :  { %2491 = vrot.lane.b32.xlu2 %v2490_v37, %s2720_s3 }
 0x62c   :  { %v2492_v46 = vpop.permute.xlu2 %2491 }
 0x62d   :  { %v2494_v50 = vunpack.i.h.bf16 %v2492_v46  ;;  %v2493_v51 = vunpack.i.l.bf16 %v2492_v46 }
 0x62e   :  { %v2482_v43 = vpop.permute.xlu0 %2481 }
 0x62f   :  { %v2484_v44 = vunpack.i.h.bf16 %v2482_v43  ;;  %v2483_v45 = vunpack.i.l.bf16 %v2482_v43  ;;  %v2529_v43 = vld [vmem:[%s3250_s9] ss:$0 sm:$0xff] }
 0x631   :  { %v808_v52 = vsel %vm268_vm8, %v2924_v62, %v2484_v44  ;;  %v807_v53 = vsel %vm268_vm8, %v365_v27, %v2483_v45 }
 0x636   :  { %v2487_v47 = vpop.permute.xlu0 %2486 }
 0x637   :  { %v2489_v48 = vunpack.i.h.bf16 %v2487_v47  ;;  %v2488_v49 = vunpack.i.l.bf16 %v2487_v47 }
 0x639   :  { %v811_v54 = vsel %vm809_vm10, %v808_v52, %v2489_v48  ;;  %v810_v55 = vsel %vm809_vm10, %v807_v53, %v2488_v49  ;;  %v2424_v52 = vld [vmem:[%s3253_s12 + $0x28] sm:$0xff]  ;;  %v2423_v53 = vld [vmem:[%s3253_s12 + $0x20] sm:$0xff] }
 0x63a   :  { %v813_v56 = vsel %vm812_vm11, %v810_v55, %v2493_v51  ;;  %v814_v57 = vsel %vm812_vm11, %v811_v54, %v2494_v50  ;;  %v2426_v50 = vld [vmem:[%s3253_s12 + $0x38] sm:$0xff]  ;;  %v2425_v51 = vld [vmem:[%s3253_s12 + $0x30] sm:$0xff] }
 0x63b   :  { %v815_v58 = vpack.c.bf16 %v814_v57, %v813_v56  ;;  %1059 = vmatpush.bf16.msra.mxu2 %v2426_v50  ;;  %v2422_v54 = vld [vmem:[%s3253_s12 + $0x18] sm:$0xff]  ;;  %v2421_v55 = vld [vmem:[%s3253_s12 + $0x10] sm:$0xff]  ;;  %v2420_v56 = vld [vmem:[%s3253_s12 + $0x8] sm:$0xff] }
 0x63c   :  { %v2530_v57 = vld [vmem:[%s3252_s11] ss:$0 sm:$0xff]  ;;  %v2271_v50 = vld [vmem:[#allocation2 + $0x68] sm:$0xf0] }
 0x63d   :  { %2197 = vmatmul.msk.bf16.vlgmr.msrb.gmra.mxu0 %vm91_vm0, %v815_v58 }
 0x63f   :  { %1060 = vmatpush.bf16.msra.mxu2 %v2425_v51 }
 0x643   :  { %1061 = vmatpush.bf16.msra.mxu2 %v2424_v52  ;;  %v2261_v52 = vld [vmem:[#allocation2 + $0x50] sm:$0xf] }
 0x647   :  { %1062 = vmatpush.bf16.msra.mxu2 %v2423_v53  ;;  %v2430_v53 = vld [vmem:[#allocation2 + $0x54] sm:$0xf0] }
 0x64b   :  { %1063 = vmatpush.bf16.msra.mxu2 %v2422_v54  ;;  %v2429_v54 = vld [vmem:[#allocation2 + $0x54] sm:$0xf] }
 0x64f   :  { %1064 = vmatpush.bf16.msra.mxu2 %v2421_v55  ;;  %v2262_v55 = vor.u32 %v2430_v53, %v2261_v52 }
 0x653   :  { %1065 = vmatpush.bf16.msra.mxu2 %v2420_v56  ;;  %v2263_v56 = vld [vmem:[#allocation2 + $0x58] sm:$0xf0] }
 0x6ba   :  { %v855_v60 = vpop.f32.mrf.mxu0 }
 0x6bb   :  { %v856_v61 = vadd.f32 %v2527_v59, %v855_v60 }
 0x6bd   :  { %v860_v62 = vadd.f32 %v856_v61, %v2855_v7 }
 0x6bf   :  { %v862_v63 = vsel %vm91_vm0, %v860_v62, 0.0 }
 0x6c0   :  { %863 = vadd.xlane.f32.xlu0 %v862_v63 }
 0x6c2   :  { %v857_v0 = vpop.f32.mrf.mxu0 }
 0x6c3   :  { %v858_v1 = vadd.f32 %v2527_v59, %v857_v0  ;;  %v2419_v59 = vld [vmem:[%s3253_s12] sm:$0xff] }
 0x6c4   :  { %1066 = vmatpush.bf16.msra.mxu2 %v2419_v59 }
 0x6c5   :  { %v861_v2 = vadd.f32 %v858_v1, %v2857_v8  ;;  %v2418_v8 = vld [vmem:[%s3251_s10 + $0x18] sm:$0xff] }
 0x6c6   :  { %979 = vmatpush.bf16.msrb.mxu1 %v2418_v8 }
 0x6c7   :  { %v865_v3 = vsel %vm91_vm0, %v861_v2, 0.0 }
 0x6c8   :  { %866 = vadd.xlane.f32.xlu1 %v865_v3 }
 0x6ca   :  { %980 = vmatpush.bf16.msrb.mxu1 %v2417_v14 }
 0x6ce   :  { %981 = vmatpush.bf16.msrb.mxu1 %v2416_v15 }
 0x6d2   :  { %982 = vmatpush.bf16.msrb.mxu1 %v2415_v20 }
 0x733   :  { %v864_v4 = vpop.xlane.xlu0 %863 }
 0x734   :  { %v868_v5 = vmul.f32 %v864_v4, %v2831_v10 }
 0x736   :  { %v870_v17 = vsub.f32 %v860_v62, %v868_v5 }
 0x738   :  { %v872_v24 = vmul.f32 %v870_v17, %v870_v17 }
 0x73a   :  { %v874_v6 = vsel %vm91_vm0, %v872_v24, 0.0 }
 0x73b   :  { %v867_v9 = vpop.xlane.xlu1 %866  ;;  %875 = vadd.xlane.f32.xlu2 %v874_v6 }
 0x73c   :  { %v869_v7 = vmul.f32 %v867_v9, %v2831_v10 }
 0x73e   :  { %v871_v11 = vsub.f32 %v861_v2, %v869_v7 }
 0x740   :  { %v873_v12 = vmul.f32 %v871_v11, %v871_v11 }
 0x742   :  { %v877_v13 = vsel %vm91_vm0, %v873_v12, 0.0 }
 0x743   :  { %878 = vadd.xlane.f32.xlu0 %v877_v13 }
 0x7ae   :  { %v876_v16 = vpop.xlane.xlu2 %875 }
 0x7af   :  { %v880_v18 = vmul.f32 %v876_v16, %v2831_v10 }
 0x7b1   :  { %v882_v19 = vadd.f32 1e-12, %v880_v18  ;;  %v2531_v18 = vld [vmem:[%s3254_s13] ss:$0 sm:$0xff] }
 0x7b3   :  { %2579 = vrsqrt.f32 %v882_v19  ;;  %vm890_vm13 = vweird.f32 %v882_v19 }
 0x7b6   :  { %v879_v21 = vpop.xlane.xlu0 %878 }
 0x7b7   :  { %v881_v22 = vmul.f32 %v879_v21, %v2831_v10 }
 0x7b9   :  { %v2580_v23 = vpop.eup %2579  ;;  %v883_v25 = vadd.f32 1e-12, %v881_v22 }
 0x7ba   :  { %v885_v26 = vmul.f32 %v2580_v23, %v882_v19  ;;  %vm891_vm12 = vweird.f32 %v2580_v23 }
 0x7bb   :  { %2581 = vrsqrt.f32 %v883_v25  ;;  %vm892_vm14 = vmor %vm890_vm13, %vm891_vm12  ;;  %vm900_vm1 = vweird.f32 %v883_v25 }
 0x7bc   :  { %v886_v27 = vmul.f32 %v2580_v23, %v885_v26 }
 0x7be   :  { %v887_v28 = vmul.f32 0.5, %v886_v27 }
 0x7c0   :  { %v888_v29 = vsub.f32 1.5, %v887_v28 }
 0x7c1   :  { %v2582_v30 = vpop.eup %2581 }
 0x7c2   :  { %v889_v31 = vmul.f32 %v2580_v23, %v888_v29  ;;  %v895_v32 = vmul.f32 %v2582_v30, %v883_v25  ;;  %vm901_vm15 = vweird.f32 %v2582_v30 }
 0x7c3   :  { %vm902_vm2 = vmor %vm900_vm1, %vm901_vm15 }
 0x7c4   :  { %v896_v33 = vmul.f32 %v2582_v30, %v895_v32  ;;  %v893_v34 = vsel %vm892_vm14, %v2580_v23, %v889_v31 }
 0x7c5   :  { %v904_v39 = vmul.f32 %v893_v34, %v870_v17 }
 0x7c6   :  { %v897_v35 = vmul.f32 0.5, %v896_v33 }
 0x7c7   :  { %v909_v44 = vmul.f32 %v2528_v38, %v904_v39  ;;  %v2277_v39 = vld [vmem:[#allocation2 + $0x70] sm:$0xf] }
 0x7c8   :  { %v898_v37 = vsub.f32 1.5, %v897_v35 }
 0x7c9   :  { %v914_v47 = vadd.f32 %v2529_v43, %v909_v44  ;;  %v2279_v44 = vld [vmem:[#allocation2 + $0x78] sm:$0xf0] }
 0x7ca   :  { %v899_v40 = vmul.f32 %v2582_v30, %v898_v37 }
 0x7cc   :  { %v903_v42 = vsel %vm902_vm2, %v2582_v30, %v899_v40  ;;  %v2434_v40 = vld [vmem:[#allocation2 + $0x74] sm:$0xf0] }
 0x7cd   :  { %v905_v45 = vmul.f32 %v903_v42, %v871_v11  ;;  %v2433_v42 = vld [vmem:[#allocation2 + $0x74] sm:$0xf] }
 0x7cf   :  { %v910_v46 = vmul.f32 %v2528_v38, %v905_v45  ;;  %v2282_v45 = vor.u32 %v2433_v42, %v2279_v44 }
 0x7d1   :  { %v915_v48 = vadd.f32 %v2529_v43, %v910_v46  ;;  %v2278_v43 = vor.u32 %v2434_v40, %v2277_v39  ;;  %1222 = vmatpush.bf16.msra.mxu0 %v2282_v45  ;;  %v2269_v46 = vld [vmem:[#allocation2 + $0x60] sm:$0xf] }
 0x7d3   :  { %v944_v49 = vpack.c.bf16 %v915_v48, %v914_v47  ;;  %1208 = vmatpush.bf16.msra.mxu3 %v2278_v43 }
 0x7d5   :  { %2214 = vmatmul.msk.bf16.vlgmr.msrb.gmra.mxu1 %vm91_vm0, %v944_v49 }
 0x852   :  { %v984_v58 = vpop.f32.mrf.mxu1 }
 0x853   :  { %v985_v60 = vadd.f32 %v2530_v57, %v984_v58  ;;  %v2266_v58 = vor.u32 %v2429_v54, %v2263_v56 }
 0x855   :  { %v989_v61 = vmul.f32 %v985_v60, %v985_v60 }
 0x857   :  { %v991_v62 = vmul.f32 %v989_v61, %v985_v60  ;;  %v2428_v61 = vld [vmem:[#allocation2 + $0x44] sm:$0xf0] }
 0x859   :  { %v993_v63 = vmul.f32 0.044715, %v991_v62  ;;  %v2427_v62 = vld [vmem:[#allocation2 + $0x44] sm:$0xf] }
 0x85a   :  { %v986_v0 = vpop.f32.mrf.mxu1 }
 0x85b   :  { %v995_v1 = vadd.f32 %v993_v63, %v985_v60  ;;  %v987_v2 = vadd.f32 %v2530_v57, %v986_v0 }
 0x85d   :  { %v997_v3 = vmul.f32 0.7978846, %v995_v1  ;;  %v990_v4 = vmul.f32 %v987_v2, %v987_v2  ;;  %v2255_v1 = vld [vmem:[#allocation2 + $0x48] sm:$0xf0] }
 0x85f   :  { %v992_v5 = vmul.f32 %v990_v4, %v987_v2  ;;  %2583 = vtanh.f32 %v997_v3 }
 0x861   :  { %v994_v17 = vmul.f32 0.044715, %v992_v5 }
 0x863   :  { %v996_v24 = vadd.f32 %v994_v17, %v987_v2 }
 0x865   :  { %v998_v6 = vmul.f32 0.7978846, %v996_v24  ;;  %v2584_v9 = vpop.eup %2583 }
 0x866   :  { %v1001_v7 = vadd.f32 1.0, %v2584_v9 }
 0x867   :  { %2585 = vtanh.f32 %v998_v6 }
 0x868   :  { %v1003_v12 = vmul.f32 0.5, %v1001_v7 }
 0x86a   :  { %v1005_v14 = vmul.f32 %v1003_v12, %v985_v60  ;;  %v2253_v60 = vld [vmem:[#allocation2 + $0x40] sm:$0xf] }
 0x86b   :  { %v2254_v0 = vor.u32 %v2428_v61, %v2253_v60 }
 0x86d   :  { %v2586_v11 = vpop.eup %2585 }
 0x86e   :  { %v1002_v13 = vadd.f32 1.0, %v2586_v11 }
 0x870   :  { %v1004_v8 = vmul.f32 0.5, %v1002_v13 }
 0x872   :  { %v1006_v15 = vmul.f32 %v1004_v8, %v987_v2  ;;  %v2258_v2 = vor.u32 %v2427_v62, %v2255_v1 }
 0x874   :  { %v1007_v16 = vpack.c.bf16 %v1006_v15, %v1005_v14 }
 0x876   :  { %1067 = vmatmul.bf16.vlgmr.msra.gmra.mxu2 %v1007_v16 }
 0x8f9   :  { %v1068_v19 = vpop.f32.mrf.mxu2 }
 0x8fa   :  { %v1069_v20 = vadd.f32 %v2531_v18, %v1068_v19 }
 0x8fc   :  { %v1073_v21 = vadd.f32 %v1069_v20, %v914_v47  ;;  %v2432_v47 = vld [vmem:[#allocation2 + $0x64] sm:$0xf0] }
 0x8fd   :  { %v2270_v49 = vor.u32 %v2432_v47, %v2269_v46 }
 0x8fe   :  { %v1075_v22 = vsel %vm91_vm0, %v1073_v21, 0.0 }
 0x8ff   :  { %1076 = vadd.xlane.f32.xlu1 %v1075_v22  ;;  %1209 = vmatpush.bf16.msra.mxu3 %v2270_v49  ;;  %v2533_v22 = vld [vmem:[%s3256_s15] ss:$0 sm:$0xff] }
 0x901   :  { %v1070_v23 = vpop.f32.mrf.mxu2 }
 0x902   :  { %v1071_v25 = vadd.f32 %v2531_v18, %v1070_v23  ;;  %v2532_v18 = vld [vmem:[%s3255_s14] ss:$0 sm:$0xff] }
 0x903   :  { %1210 = vmatpush.bf16.msra.mxu3 %v2262_v55 }
 0x904   :  { %v1074_v26 = vadd.f32 %v1071_v25, %v915_v48  ;;  %v2431_v48 = vld [vmem:[#allocation2 + $0x64] sm:$0xf] }
 0x905   :  { %v2274_v51 = vor.u32 %v2431_v48, %v2271_v50 }
 0x906   :  { %v1078_v27 = vsel %vm91_vm0, %v1074_v26, 0.0 }
 0x907   :  { %1079 = vadd.xlane.f32.xlu2 %v1078_v27  ;;  %1223 = vmatpush.bf16.msra.mxu0 %v2274_v51 }
 0x908   :  { %1211 = vmatpush.bf16.msra.mxu3 %v2254_v0 }
 0x90b   :  { %1224 = vmatpush.bf16.msra.mxu0 %v2266_v58 }
 0x90f   :  { %1225 = vmatpush.bf16.msra.mxu0 %v2258_v2 }
 0x972   :  { %v1077_v28 = vpop.xlane.xlu1 %1076 }
 0x973   :  { %v1081_v29 = vmul.f32 %v1077_v28, %v2831_v10 }
 0x975   :  { %v3035_v30 = vsub.f32 %v1073_v21, %v1081_v29 }
 0x977   :  { %v1085_v31 = vmul.f32 %v3035_v30, %v3035_v30 }
 0x979   :  { %v1087_v32 = vsel %vm91_vm0, %v1085_v31, 0.0 }
 0x97a   :  { %v1080_v33 = vpop.xlane.xlu2 %1079  ;;  %1088 = vadd.xlane.f32.xlu0 %v1087_v32 }
 0x97b   :  { %v1082_v34 = vmul.f32 %v1080_v33, %v2831_v10 }
 0x97d   :  { %v3041_v35 = vsub.f32 %v1074_v26, %v1082_v34 }
 0x97f   :  { %v1086_v37 = vmul.f32 %v3041_v35, %v3041_v35 }
 0x981   :  { %v1090_v38 = vsel %vm91_vm0, %v1086_v37, 0.0 }
 0x982   :  { %1091 = vadd.xlane.f32.xlu1 %v1090_v38 }
 0x9ed   :  { %v1089_v57 = vpop.xlane.xlu0 %1088 }
 0x9ee   :  { %v1093_v59 = vmul.f32 %v1089_v57, %v2831_v10 }
 0x9f0   :  { %v1095_v63 = vadd.f32 1e-12, %v1093_v59 }
 0x9f2   :  { %2587 = vrsqrt.f32 %v1095_v63  ;;  %vm1103_vm4 = vweird.f32 %v1095_v63 }
 0x9f5   :  { %v1092_v3 = vpop.xlane.xlu1 %1091 }
 0x9f6   :  { %v1094_v4 = vmul.f32 %v1092_v3, %v2831_v10 }
 0x9f8   :  { %v2588_v5 = vpop.eup %2587  ;;  %v1096_v17 = vadd.f32 1e-12, %v1094_v4 }
 0x9f9   :  { %v1098_v24 = vmul.f32 %v2588_v5, %v1095_v63  ;;  %vm1104_vm3 = vweird.f32 %v2588_v5 }
 0x9fa   :  { %2589 = vrsqrt.f32 %v1096_v17  ;;  %vm1105_vm5 = vmor %vm1103_vm4, %vm1104_vm3  ;;  %vm1113_vm7 = vweird.f32 %v1096_v17 }
 0x9fb   :  { %v1099_v6 = vmul.f32 %v2588_v5, %v1098_v24 }
 0x9fd   :  { %v1100_v9 = vmul.f32 0.5, %v1099_v6 }
 0x9ff   :  { %v1101_v7 = vsub.f32 1.5, %v1100_v9 }
 0xa00   :  { %v2590_v11 = vpop.eup %2589 }
 0xa01   :  { %v1102_v12 = vmul.f32 %v2588_v5, %v1101_v7  ;;  %v1108_v13 = vmul.f32 %v2590_v11, %v1096_v17  ;;  %vm1114_vm6 = vweird.f32 %v2590_v11 }
 0xa02   :  { %vm1115_vm12 = vmor %vm1113_vm7, %vm1114_vm6 }
 0xa03   :  { %v1109_v8 = vmul.f32 %v2590_v11, %v1108_v13  ;;  %v1106_v14 = vsel %vm1105_vm5, %v2588_v5, %v1102_v12 }
 0xa04   :  { %v1117_v19 = vmul.f32 %v1106_v14, %v3035_v30  ;;  %v2247_v30 = vld [vmem:[%s3246_s5 + $0x2] sm:$0x3] }
 0xa05   :  { %v1110_v15 = vmul.f32 0.5, %v1109_v8  ;;  %v1157_v31 = vperm.slane %v2247_v30, 0  ;;  %v1158_v39 = vperm.slane %v2247_v30, 1 }
 0xa06   :  { %v1122_v23 = vmul.f32 %v2532_v18, %v1117_v19 }
 0xa07   :  { %v1111_v16 = vsub.f32 1.5, %v1110_v15 }
 0xa08   :  { %v3056_v27 = vadd.f32 %v2533_v22, %v1122_v23 }
 0xa09   :  { %v1112_v20 = vmul.f32 %v2590_v11, %v1111_v16 }
 0xa0b   :  { %v1116_v21 = vsel %vm1115_vm12, %v2590_v11, %v1112_v20 }
 0xa0c   :  { %v1118_v25 = vmul.f32 %v1116_v21, %v3041_v35 }
 0xa0e   :  { %v1123_v26 = vmul.f32 %v2532_v18, %v1118_v25 }
 0xa10   :  { %v3058_v28 = vadd.f32 %v2533_v22, %v1123_v26 }
 0xa12   :  { %v1155_v29 = vpack.c.bf16 %v3058_v28, %v3056_v27 }
 0xa14   :  { %2283 = vmatmul.msk.bf16.vlgmr.msra.gmra.mxu3 %vm91_vm0, %v1155_v29  ;;  %2284 = vmatmul.msk.bf16.vlgmr.msra.gmra.mxu0 %vm91_vm0, %v1155_v29 }
 0xa91   :  { %v1227_v40 = vpop.f32.mrf.mxu0 }
 0xa92   :  { %v3075_v42 = vadd.f32 %v1227_v40, %v1158_v39 }
 0xa97   :  { %v1213_v32 = vpop.f32.mrf.mxu3 }
 0xa98   :  { %v1214_v33 = vadd.f32 %v1213_v32, %v1157_v31 }
 0xa99   :  { %v1229_v55 = vpop.f32.mrf.mxu0 }
 0xa9a   :  { %1360 = vrot.lane.b32.xlu1 %v1214_v33, %s2720_s3  ;;  %1235 = vrot.lane.b32.xlu2 %v1214_v33, %s2717_s18  ;;  %v1232_v38 = vmul.f32 0.25, %v1214_v33  ;;  %v3091_v56 = vadd.f32 %v1229_v55, %v1158_v39 }
 0xa9f   :  { %v1215_v34 = vpop.f32.mrf.mxu3 }
 0xaa0   :  { %v1216_v35 = vadd.f32 %v1215_v34, %v1157_v31 }
 0xaa2   :  { %1492 = vrot.lane.b32.xlu1 %v1214_v33, %s2722_s0  ;;  %1388 = vrot.lane.b32.xlu2 %v1216_v35, %s2720_s3  ;;  %v1233_v37 = vmul.f32 0.25, %v1216_v35 }
 0xaaa   :  { %1518 = vrot.lane.b32.xlu1 %v1233_v37, %s2723_s17  ;;  %1386 = vrot.lane.b32.xlu2 %v1233_v37, %s2721_s28 }
 0xab2   :  { %1490 = vrot.lane.b32.xlu2 %v1232_v38, %s2723_s17 }
 0xaba   :  { %1650 = vrot.lane.b32.xlu2 %v1216_v35, %s2725_s20 }
 0xaf4   :  { %v1236_v43 = vpop.permute.xlu2 %1235 }
 0xaf5   :  { %2285 = vmatpush.xpose.msk.msra.mxu1 %vm268_vm8, %v1236_v43 }
 0xaf8   :  { %2286 = vmatmul.msk.f32.vlgmr.msra.gmra.mxu1 %vm268_vm8, %v1232_v38 }
 0xaf9   :  { %1330 = vmatpush.msrb.mxu1 %v3075_v42 }
 0xafc   :  { %v1389_v44 = vpop.permute.xlu2 %1388 }
 0xafd   :  { %2293 = vmatpush.xpose.msk.msra.mxu1 %vm268_vm8, %v1389_v44 }
 0xb04   :  { %v1387_v58 = vpop.permute.xlu2 %1386 }
 0xb0c   :  { %v1361_v45 = vpop.permute.xlu1 %1360  ;;  %v1491_v60 = vpop.permute.xlu2 %1490 }
 0xb0d   :  { %2291 = vmatpush.xpose.msk.msrb.mxu0 %vm268_vm8, %v1361_v45 }
 0xb14   :  { %v1493_v46 = vpop.permute.xlu1 %1492  ;;  %v1651_v3 = vpop.permute.xlu2 %1650 }
 0xb15   :  { %2297 = vmatpush.xpose.msk.msra.mxu0 %vm268_vm8, %v1493_v46 }
 0xb1c   :  { %v1519_v63 = vpop.permute.xlu1 %1518 }
 0xb75   :  { %v1259_v47 = vpop.f32.mrf.mxu1 }
 0xb76   :  { %v1260_v48 = vadd.f32 %v1259_v47, %v2905_v41 }
 0xb78   :  { %v1290_v49 = vsel %vm322_vm9, %v1260_v48, -inf }
 0xb79   :  { %1291 = vmax.xlane.f32.xlu0 %v1290_v49 }
 0xb8d   :  { %1263 = vrot.lane.b32.xlu0 %v1216_v35, %s2717_s18 }
 0xb95   :  { %1358 = vrot.lane.b32.xlu0 %v1232_v38, %s2721_s28 }
 0xb9d   :  { %1520 = vrot.lane.b32.xlu0 %v1216_v35, %s2722_s0 }
 0xba5   :  { %1622 = vrot.lane.b32.xlu0 %v1214_v33, %s2725_s20 }
 0xbad   :  { %1648 = vrot.lane.b32.xlu0 %v1233_v37, %s2724_s4 }
 0xbec   :  { %v1292_v50 = vpop.xlane.xlu0 %1291 }
 0xbed   :  { %v1296_v51 = vsub.f32 %v1260_v48, %v1292_v50 }
 0xbef   :  { %v1298_v52 = vmul.f32 1.442695, %v1296_v51 }
 0xbf1   :  { %2591 = vpow2.f32 %v1298_v52 }
 0xbf7   :  { %v2592_v53 = vpop.eup %2591 }
 0xbf8   :  { %v1302_v54 = vsel %vm322_vm9, %v2592_v53, 0.0 }
 0xbf9   :  { %1303 = vadd.xlane.f32.xlu1 %v1302_v54 }
 0xbff   :  { %v1264_v57 = vpop.permute.xlu0 %1263 }
 0xc00   :  { %2287 = vmatpush.xpose.msk.msrb.mxu3 %vm268_vm8, %v1264_v57 }
 0xc03   :  { %2288 = vmatmul.msk.f32.vlgmr.msrb.gmra.mxu3 %vm268_vm8, %v1233_v37 }
 0xc04   :  { %1353 = vmatpush.msra.mxu3 %v3091_v56 }
 0xc07   :  { %v1359_v59 = vpop.permute.xlu0 %1358 }
 0xc08   :  { %2292 = vmatmul.msk.f32.vlgmr.msrb.gmra.mxu0 %vm268_vm8, %v1359_v59 }
 0xc0f   :  { %v1521_v61 = vpop.permute.xlu0 %1520 }
 0xc10   :  { %2298 = vmatmul.msk.f32.vlgmr.msra.gmra.mxu0 %vm268_vm8, %v1491_v60 }
 0xc12   :  { %1620 = vrot.lane.b32.xlu1 %v1232_v38, %s2724_s4 }
 0xc17   :  { %v1623_v62 = vpop.permute.xlu0 %1622 }
 0xc18   :  { %2303 = vmatpush.xpose.msk.msrb.mxu0 %vm268_vm8, %v1623_v62 }
 0xc1f   :  { %v1649_v11 = vpop.permute.xlu0 %1648 }
 0xc6c   :  { %v1304_v0 = vpop.xlane.xlu1 %1303 }
 0xc6d   :  { %2593 = vrcp.f32 %v1304_v0 }
 0xc73   :  { %v2594_v1 = vpop.eup %2593 }
 0xc74   :  { %v1310_v2 = vmul.f32 %v2594_v1, %v2592_v53 }
 0xc76   :  { %2289 = vmatmul.msk.f32.vlgmr.msrb.gmra.mxu1 %vm322_vm9, %v1310_v2 }
 0xc77   :  { %2299 = vmatpush.xpose.msk.msrb.mxu1 %vm268_vm8, %v1521_v61 }
 0xc7e   :  { %2294 = vmatmul.msk.f32.vlgmr.msra.gmra.mxu1 %vm268_vm8, %v1387_v58 }
 0xc7f   :  { %2305 = vmatpush.xpose.msk.msra.mxu1 %vm268_vm8, %v1651_v3 }
 0xc84   :  { %v1621_v4 = vpop.permute.xlu1 %1620 }
 0xc85   :  { %v1383_v5 = vpop.f32.mrf.mxu0  ;;  %2304 = vmatmul.msk.f32.vlgmr.msrb.gmra.mxu0 %vm268_vm8, %v1621_v4 }
 0xc86   :  { %v1384_v17 = vadd.f32 %v1383_v5, %v2905_v41  ;;  %v1287_v24 = vpop.f32.mrf.mxu3  ;;  %2300 = vmatmul.msk.f32.vlgmr.msrb.gmra.mxu1 %vm268_vm8, %v1519_v63 }
 0xc87   :  { %v1288_v6 = vadd.f32 %v1287_v24, %v2898_v36  ;;  %v2495_v24 = vpack.i.bf16 %v3091_v56, %v3075_v42 }
 0xc88   :  { %v1414_v9 = vsel %vm322_vm9, %v1384_v17, -inf }
 0xc89   :  { %1415 = vmax.xlane.f32.xlu1 %v1414_v9  ;;  %v1293_v7 = vsel %vm322_vm9, %v1288_v6, -inf }
 0xc8a   :  { %1294 = vmax.xlane.f32.xlu2 %v1293_v7 }
 0xc8d   :  { %v1515_v12 = vpop.f32.mrf.mxu0 }
 0xc8e   :  { %v1516_v13 = vadd.f32 %v1515_v12, %v2905_v41  ;;  %2306 = vmatmul.msk.f32.vlgmr.msra.gmra.mxu1 %vm268_vm8, %v1649_v11 }
 0xc90   :  { %v1546_v8 = vsel %vm322_vm9, %v1516_v13, -inf }
 0xc92   :  { %1547 = vmax.xlane.f32.xlu2 %v1546_v8 }
 0xcf3   :  { %v3113_v14 = vpop.f32.mrf.mxu1 }
 0xcfb   :  { %v1411_v15 = vpop.f32.mrf.mxu1 }
 0xcfc   :  { %v1412_v16 = vadd.f32 %v1411_v15, %v2898_v36  ;;  %v1416_v18 = vpop.xlane.xlu1 %1415 }
 0xcfd   :  { %v1420_v19 = vsub.f32 %v1384_v17, %v1416_v18  ;;  %v1295_v20 = vpop.xlane.xlu2 %1294 }
 0xcfe   :  { %v1297_v21 = vsub.f32 %v1288_v6, %v1295_v20  ;;  %v1417_v22 = vsel %vm322_vm9, %v1412_v16, -inf }
 0xcff   :  { %1418 = vmax.xlane.f32.xlu0 %v1417_v22  ;;  %v1422_v23 = vmul.f32 1.442695, %v1420_v19 }
 0xd00   :  { %v1300_v25 = vmul.f32 1.442695, %v1297_v21 }
 0xd01   :  { %2595 = vpow2.f32 %v1422_v23 }
 0xd02   :  { %v1645_v26 = vpop.f32.mrf.mxu0  ;;  %2597 = vpow2.f32 %v1300_v25 }
 0xd03   :  { %v1646_v29 = vadd.f32 %v1645_v26, %v2905_v41  ;;  %v1543_v30 = vpop.f32.mrf.mxu1 }
 0xd04   :  { %v1544_v31 = vadd.f32 %v1543_v30, %v2898_v36 }
 0xd05   :  { %v1548_v32 = vpop.xlane.xlu2 %1547  ;;  %v1676_v33 = vsel %vm322_vm9, %v1646_v29, -inf }
 0xd06   :  { %v1552_v34 = vsub.f32 %v1516_v13, %v1548_v32  ;;  %v1549_v35 = vsel %vm322_vm9, %v1544_v31, -inf }
 0xd07   :  { %1550 = vmax.xlane.f32.xlu1 %v1549_v35  ;;  %1677 = vmax.xlane.f32.xlu0 %v1676_v33  ;;  %v2596_v38 = vpop.eup %2595 }
 0xd08   :  { %v1554_v37 = vmul.f32 1.442695, %v1552_v34  ;;  %v2598_v39 = vpop.eup %2597  ;;  %v1426_v44 = vsel %vm322_vm9, %v2596_v38, 0.0 }
 0xd09   :  { %v1305_v41 = vsel %vm322_vm9, %v2598_v39, 0.0 }
 0xd0a   :  { %2599 = vpow2.f32 %v1554_v37 }
 0xd0b   :  { %v1673_v40 = vpop.f32.mrf.mxu1 }
 0xd0c   :  { %v1674_v43 = vadd.f32 %v1673_v40, %v2898_v36 }
 0xd0e   :  { %v1679_v45 = vsel %vm322_vm9, %v1674_v43, -inf }
 0xd0f   :  { %1306 = vadd.xlane.f32.xlu1 %v1305_v41  ;;  %1427 = vadd.xlane.f32.xlu0 %v1426_v44 }
 0xd10   :  { %1680 = vmax.xlane.f32.xlu2 %v1679_v45  ;;  %v3125_v46 = vpop.eup %2599 }
 0xd11   :  { %v1558_v47 = vsel %vm322_vm9, %v3125_v46, 0.0 }
 0xd17   :  { %1559 = vadd.xlane.f32.xlu1 %v1558_v47 }
 0xd72   :  { %v1419_v48 = vpop.xlane.xlu0 %1418 }
 0xd73   :  { %v1421_v49 = vsub.f32 %v1412_v16, %v1419_v48 }
 0xd75   :  { %v1424_v50 = vmul.f32 1.442695, %v1421_v49  ;;  %v2438_v49 = vld [vmem:[#allocation5 + $0x38] sm:$0xff] }
 0xd76   :  { %1815 = vmatpush.bf16.msra.mxu0 %v2438_v49 }
 0xd77   :  { %2601 = vpow2.f32 %v1424_v50  ;;  %v2437_v50 = vld [vmem:[#allocation5 + $0x30] sm:$0xff] }
 0xd7a   :  { %v1551_v36 = vpop.xlane.xlu1 %1550  ;;  %v1678_v51 = vpop.xlane.xlu0 %1677  ;;  %1816 = vmatpush.bf16.msra.mxu0 %v2437_v50 }
 0xd7b   :  { %v1553_v52 = vsub.f32 %v1544_v31, %v1551_v36  ;;  %v1682_v53 = vsub.f32 %v1646_v29, %v1678_v51  ;;  %v2436_v36 = vld [vmem:[#allocation5 + $0x28] sm:$0xff]  ;;  %v2435_v51 = vld [vmem:[#allocation5 + $0x20] sm:$0xff] }
 0xd7d   :  { %v2602_v54 = vpop.eup %2601  ;;  %v1556_v55 = vmul.f32 1.442695, %v1553_v52  ;;  %v1684_v57 = vmul.f32 1.442695, %v1682_v53 }
 0xd7e   :  { %v1429_v58 = vsel %vm322_vm9, %v2602_v54, 0.0  ;;  %1817 = vmatpush.bf16.msra.mxu0 %v2436_v36  ;;  %v2536_v36 = vld [vmem:[%s3250_s9 + $0x1] ss:$0 sm:$0xff] }
 0xd7f   :  { %2603 = vpow2.f32 %v1556_v55  ;;  %1430 = vadd.xlane.f32.xlu2 %v1429_v58 }
 0xd80   :  { %2605 = vpow2.f32 %v1684_v57 }
 0xd82   :  { %v1307_v59 = vpop.xlane.xlu1 %1306  ;;  %v1428_v6 = vpop.xlane.xlu0 %1427  ;;  %1818 = vmatpush.bf16.msra.mxu0 %v2435_v51 }
 0xd83   :  { %2607 = vrcp.f32 %v1307_v59  ;;  %v1681_v60 = vpop.xlane.xlu2 %1680 }
 0xd84   :  { %v1683_v61 = vsub.f32 %v1674_v43, %v1681_v60 }
 0xd85   :  { %v2604_v62 = vpop.eup %2603 }
 0xd86   :  { %v2606_v63 = vpop.eup %2605  ;;  %v1686_v0 = vmul.f32 1.442695, %v1683_v61  ;;  %v1561_v1 = vsel %vm322_vm9, %v2604_v62, 0.0 }
 0xd87   :  { %1562 = vadd.xlane.f32.xlu0 %v1561_v1  ;;  %v1688_v2 = vsel %vm322_vm9, %v2606_v63, 0.0 }
 0xd88   :  { %2609 = vpow2.f32 %v1686_v0  ;;  %1689 = vadd.xlane.f32.xlu1 %v1688_v2 }
 0xd89   :  { %v2608_v3 = vpop.eup %2607  ;;  %2611 = vrcp.f32 %v1428_v6 }
 0xd8a   :  { %v1311_v4 = vmul.f32 %v2608_v3, %v2598_v39  ;;  %v1560_v42 = vpop.xlane.xlu1 %1559 }
 0xd8c   :  { %2290 = vmatmul.msk.f32.vlgmr.msra.gmra.mxu3 %vm322_vm9, %v1311_v4 }
 0xd8e   :  { %v2610_v5 = vpop.eup %2609 }
 0xd8f   :  { %v1691_v17 = vsel %vm322_vm9, %v2610_v5, 0.0  ;;  %v2612_v7 = vpop.eup %2611 }
 0xd90   :  { %1692 = vadd.xlane.f32.xlu0 %v1691_v17  ;;  %v1434_v15 = vmul.f32 %v2612_v7, %v2596_v38 }
 0xd97   :  { %2496 = vrot.lane.b32.xlu2 %v2495_v24, %s2721_s28 }
 0xda1   :  { %2501 = vrot.lane.b32.xlu1 %v2495_v24, %s2723_s17 }
 0xda4   :  { %2506 = vrot.lane.b32.xlu0 %v2495_v24, %s2724_s4 }
 0xdf2   :  { %v1431_v9 = vpop.xlane.xlu2 %1430 }
 0xdf3   :  { %2613 = vrcp.f32 %v1431_v9 }
 0xdf4   :  { %2615 = vrcp.f32 %v1560_v42 }
 0xdf9   :  { %v2614_v11 = vpop.eup %2613 }
 0xdfa   :  { %v2497_v12 = vpop.permute.xlu2 %2496  ;;  %v1435_v16 = vmul.f32 %v2614_v11, %v2602_v54  ;;  %v1563_v56 = vpop.xlane.xlu0 %1562 }
 0xdfb   :  { %v2499_v13 = vunpack.i.h.bf16 %v2497_v12  ;;  %v2498_v8 = vunpack.i.l.bf16 %v2497_v12  ;;  %v1690_v18 = vpop.xlane.xlu1 %1689  ;;  %2617 = vrcp.f32 %v1563_v56  ;;  %v2616_v20 = vpop.eup %2615 }
 0xdfc   :  { %2619 = vrcp.f32 %v1690_v18  ;;  %v1566_v26 = vmul.f32 %v2616_v20, %v3125_v46 }
 0xdfd   :  { %1458 = vmatpush.msrb.mxu2 %v2498_v8  ;;  %1485 = vmatpush.msrb.mxu3 %v2499_v13 }
 0xdfe   :  { %2295 = vmatmul.msk.f32.vlgmr.msrb.gmra.mxu2 %vm322_vm9, %v1434_v15  ;;  %2296 = vmatmul.msk.f32.vlgmr.msrb.gmra.mxu3 %vm322_vm9, %v1435_v16 }
 0xe01   :  { %v2618_v21 = vpop.eup %2617 }
 0xe02   :  { %v1567_v29 = vmul.f32 %v2618_v21, %v2604_v62  ;;  %v2620_v33 = vpop.eup %2619  ;;  %v2441_v21 = vld [vmem:[%s3251_s10 + $0x30] sm:$0xff] }
 0xe03   :  { %v1693_v19 = vpop.xlane.xlu0 %1692  ;;  %v1696_v35 = vmul.f32 %v2620_v33, %v2606_v63 }
 0xe04   :  { %2621 = vrcp.f32 %v1693_v19 }
 0xe0a   :  { %v2622_v34 = vpop.eup %2621 }
 0xe0b   :  { %v1697_v37 = vmul.f32 %v2622_v34, %v2610_v5  ;;  %v2534_v5 = vld [vmem:[%s3248_s7 + $0x1] ss:$0 sm:$0xff] }
 0xe0f   :  { %v1355_v38 = vpop.f32.mrf.mxu3 }
 0xe13   :  { %v2502_v22 = vpop.permute.xlu1 %2501 }
 0xe14   :  { %v2504_v23 = vunpack.i.h.bf16 %v2502_v22  ;;  %v2503_v25 = vunpack.i.l.bf16 %v2502_v22  ;;  %v2440_v22 = vld [vmem:[%s3251_s10 + $0x28] sm:$0xff] }
 0xe16   :  { %1589 = vmatpush.msra.mxu2 %v2503_v25  ;;  %1615 = vmatpush.msra.mxu3 %v2504_v23  ;;  %v2507_v30 = vpop.permute.xlu0 %2506 }
 0xe17   :  { %v2509_v31 = vunpack.i.h.bf16 %v2507_v30  ;;  %v2508_v32 = vunpack.i.l.bf16 %v2507_v30  ;;  %2301 = vmatmul.msk.f32.vlgmr.msra.gmra.mxu2 %vm322_vm9, %v1566_v26  ;;  %2302 = vmatmul.msk.f32.vlgmr.msra.gmra.mxu3 %vm322_vm9, %v1567_v29  ;;  %v2439_v26 = vld [vmem:[%s3251_s10 + $0x20] sm:$0xff] }
 0xe19   :  { %1719 = vmatpush.msrb.mxu2 %v2508_v32  ;;  %1745 = vmatpush.msrb.mxu3 %v2509_v31 }
 0xe1f   :  { %2307 = vmatmul.msk.f32.vlgmr.msrb.gmra.mxu2 %vm322_vm9, %v1696_v35  ;;  %2308 = vmatmul.msk.f32.vlgmr.msrb.gmra.mxu3 %vm322_vm9, %v1697_v37 }
 0xe81   :  { %v1460_v39 = vpop.f32.mrf.mxu2  ;;  %v1487_v40 = vpop.f32.mrf.mxu3 }
 0xe82   :  { %v2510_v43 = vpack.i.bf16 %v1487_v40, %v1460_v39 }
 0xe84   :  { %2511 = vrot.lane.b32.xlu2 %v2510_v43, %s2725_s20 }
 0xe9a   :  { %v1591_v41 = vpop.f32.mrf.mxu2  ;;  %v1617_v44 = vpop.f32.mrf.mxu3 }
 0xe9b   :  { %v2515_v45 = vpack.i.bf16 %v1617_v44, %v1591_v41 }
 0xe9d   :  { %2516 = vrot.lane.b32.xlu2 %v2515_v45, %s2722_s0 }
 0xea2   :  { %v1721_v46 = vpop.f32.mrf.mxu2  ;;  %v1747_v47 = vpop.f32.mrf.mxu3 }
 0xea3   :  { %v2520_v48 = vpack.i.bf16 %v1747_v47, %v1721_v46  ;;  %v2535_v47 = vld [vmem:[%s3249_s8 + $0x1] ss:$0 sm:$0xff] }
 0xea5   :  { %2521 = vrot.lane.b32.xlu0 %v2520_v48, %s2720_s3 }
 0xede   :  { %v2512_v52 = vpop.permute.xlu2 %2511 }
 0xedf   :  { %v2514_v54 = vunpack.i.h.bf16 %v2512_v52  ;;  %v2513_v55 = vunpack.i.l.bf16 %v2512_v52 }
 0xee1   :  { %v1775_v60 = vsel %vm268_vm8, %v1355_v38, %v2514_v54  ;;  %v1774_v61 = vsel %vm268_vm8, %v3113_v14, %v2513_v55 }
 0xef7   :  { %v2517_v53 = vpop.permute.xlu2 %2516 }
 0xef8   :  { %v2519_v57 = vunpack.i.h.bf16 %v2517_v53  ;;  %v2518_v58 = vunpack.i.l.bf16 %v2517_v53 }
 0xefa   :  { %v1777_v0 = vsel %vm809_vm10, %v1775_v60, %v2519_v57  ;;  %v1776_v1 = vsel %vm809_vm10, %v1774_v61, %v2518_v58  ;;  %v2450_v58 = vld [vmem:[%s3253_s12 + $0x78] sm:$0xff]  ;;  %v2448_v60 = vld [vmem:[%s3253_s12 + $0x68] sm:$0xff]  ;;  %v2447_v61 = vld [vmem:[%s3253_s12 + $0x60] sm:$0xff] }
 0xefb   :  { %2030 = vmatpush.bf16.msra.mxu2 %v2450_v58 }
 0xf17   :  { %v2522_v59 = vpop.permute.xlu0 %2521 }
 0xf18   :  { %v2524_v62 = vunpack.i.h.bf16 %v2522_v59  ;;  %v2523_v63 = vunpack.i.l.bf16 %v2522_v59  ;;  %v2449_v59 = vld [vmem:[%s3253_s12 + $0x70] sm:$0xff] }
 0xf19   :  { %2031 = vmatpush.bf16.msra.mxu2 %v2449_v59 }
 0xf1a   :  { %v1779_v2 = vsel %vm812_vm11, %v1777_v0, %v2524_v62  ;;  %v1778_v3 = vsel %vm812_vm11, %v1776_v1, %v2523_v63  ;;  %v2446_v62 = vld [vmem:[%s3253_s12 + $0x58] sm:$0xff]  ;;  %v2445_v63 = vld [vmem:[%s3253_s12 + $0x50] sm:$0xff]  ;;  %v2444_v0 = vld [vmem:[%s3253_s12 + $0x48] sm:$0xff] }
 0xf1b   :  { %v1780_v4 = vpack.c.bf16 %v1779_v2, %v1778_v3  ;;  %v2537_v1 = vld [vmem:[%s3252_s11 + $0x1] ss:$0 sm:$0xff] }
 0xf1c   :  { %v2443_v2 = vld [vmem:[%s3253_s12 + $0x40] sm:$0xff] }
 0xf1d   :  { %2325 = vmatmul.msk.bf16.vlgmr.msra.gmra.mxu0 %vm91_vm0, %v1780_v4  ;;  %2032 = vmatpush.bf16.msra.mxu2 %v2448_v60  ;;  %v2539_v60 = vld [vmem:[%s3255_s14 + $0x1] ss:$0 sm:$0xff]  ;;  %s2726_s14 = smov [#allocation7]  }
 0xf1e   :  { %s2106_s6 = sshll.u32 %s2726_s14, 4  ;;  %s2107_s6 = int_to_ptr.vmem [resolvable:$true] %s2106_s6 }
 0xf21   :  { %2033 = vmatpush.bf16.msra.mxu2 %v2447_v61 }
 0xf25   :  { %2034 = vmatpush.bf16.msra.mxu2 %v2446_v62 }
 0xf29   :  { %2035 = vmatpush.bf16.msra.mxu2 %v2445_v63  ;;  %v2540_v63 = vld [vmem:[%s3256_s15 + $0x1] ss:$0 sm:$0xff] }
 0xf2d   :  { %2036 = vmatpush.bf16.msra.mxu2 %v2444_v0 }
 0xf31   :  { %2037 = vmatpush.bf16.msra.mxu2 %v2443_v2 }
 0xf9a   :  { %v1820_v17 = vpop.f32.mrf.mxu0 }
 0xf9b   :  { %v1821_v24 = vadd.f32 %v2534_v5, %v1820_v17 }
 0xf9d   :  { %v1825_v14 = vadd.f32 %v1821_v24, %v3056_v27 }
 0xf9f   :  { %v1827_v6 = vsel %vm91_vm0, %v1825_v14, 0.0 }
 0xfa0   :  { %1828 = vadd.xlane.f32.xlu1 %v1827_v6 }
 0xfa2   :  { %v1822_v9 = vpop.f32.mrf.mxu0 }
 0xfa3   :  { %v1823_v7 = vadd.f32 %v2534_v5, %v1822_v9 }
 0xfa5   :  { %v1826_v11 = vadd.f32 %v1823_v7, %v3058_v28  ;;  %v2442_v28 = vld [vmem:[%s3251_s10 + $0x38] sm:$0xff] }
 0xfa6   :  { %1950 = vmatpush.bf16.msrb.mxu1 %v2442_v28 }
 0xfa7   :  { %v1830_v12 = vsel %vm91_vm0, %v1826_v11, 0.0 }
 0xfa8   :  { %1831 = vadd.xlane.f32.xlu2 %v1830_v12 }
 0xfaa   :  { %1951 = vmatpush.bf16.msrb.mxu1 %v2441_v21 }
 0xfae   :  { %1952 = vmatpush.bf16.msrb.mxu1 %v2440_v22  ;;  %v2538_v22 = vld [vmem:[%s3254_s13 + $0x1] ss:$0 sm:$0xff] }
 0xfb2   :  { %1953 = vmatpush.bf16.msrb.mxu1 %v2439_v26 }
0x1013   :  { %v1829_v13 = vpop.xlane.xlu1 %1828 }
0x1014   :  { %v1833_v8 = vmul.f32 %v1829_v13, %v2831_v10 }
0x1016   :  { %v1835_v15 = vsub.f32 %v1825_v14, %v1833_v8 }
0x1018   :  { %v1837_v16 = vmul.f32 %v1835_v15, %v1835_v15 }
0x101a   :  { %v1839_v42 = vsel %vm91_vm0, %v1837_v16, 0.0 }
0x101b   :  { %v1832_v56 = vpop.xlane.xlu2 %1831  ;;  %1840 = vadd.xlane.f32.xlu0 %v1839_v42 }
0x101c   :  { %v1834_v27 = vmul.f32 %v1832_v56, %v2831_v10 }
0x101e   :  { %v1836_v18 = vsub.f32 %v1826_v11, %v1834_v27 }
0x1020   :  { %v1838_v19 = vmul.f32 %v1836_v18, %v1836_v18 }
0x1022   :  { %v1842_v20 = vsel %vm91_vm0, %v1838_v19, 0.0 }
0x1023   :  { %1843 = vadd.xlane.f32.xlu1 %v1842_v20 }
0x108e   :  { %v1841_v23 = vpop.xlane.xlu0 %1840 }
0x108f   :  { %v1845_v25 = vmul.f32 %v1841_v23, %v2831_v10 }
0x1091   :  { %v1847_v29 = vadd.f32 1e-12, %v1845_v25 }
0x1093   :  { %2623 = vrsqrt.f32 %v1847_v29  ;;  %vm1855_vm9 = vweird.f32 %v1847_v29 }
0x1096   :  { %v1844_v30 = vpop.xlane.xlu1 %1843 }
0x1097   :  { %v1846_v31 = vmul.f32 %v1844_v30, %v2831_v10 }
0x1099   :  { %v2624_v32 = vpop.eup %2623  ;;  %v1848_v33 = vadd.f32 1e-12, %v1846_v31 }
0x109a   :  { %v1850_v34 = vmul.f32 %v2624_v32, %v1847_v29  ;;  %vm1856_vm8 = vweird.f32 %v2624_v32 }
0x109b   :  { %2625 = vrsqrt.f32 %v1848_v33  ;;  %vm1857_vm10 = vmor %vm1855_vm9, %vm1856_vm8  ;;  %vm1865_vm13 = vweird.f32 %v1848_v33 }
0x109c   :  { %v1851_v35 = vmul.f32 %v2624_v32, %v1850_v34 }
0x109e   :  { %v1852_v37 = vmul.f32 0.5, %v1851_v35 }
0x10a0   :  { %v1853_v38 = vsub.f32 1.5, %v1852_v37 }
0x10a1   :  { %v2626_v39 = vpop.eup %2625 }
0x10a2   :  { %v1854_v40 = vmul.f32 %v2624_v32, %v1853_v38  ;;  %v1860_v43 = vmul.f32 %v2626_v39, %v1848_v33  ;;  %vm1866_vm11 = vweird.f32 %v2626_v39 }
0x10a3   :  { %vm1867_vm14 = vmor %vm1865_vm13, %vm1866_vm11 }
0x10a4   :  { %v1861_v41 = vmul.f32 %v2626_v39, %v1860_v43  ;;  %v1858_v44 = vsel %vm1857_vm10, %v2624_v32, %v1854_v40 }
0x10a5   :  { %v1869_v48 = vmul.f32 %v1858_v44, %v1835_v15 }
0x10a6   :  { %v1862_v45 = vmul.f32 0.5, %v1861_v41 }
0x10a7   :  { %v1874_v51 = vmul.f32 %v2535_v47, %v1869_v48 }
0x10a8   :  { %v1863_v46 = vsub.f32 1.5, %v1862_v45 }
0x10a9   :  { %v1879_v54 = vadd.f32 %v2536_v36, %v1874_v51 }
0x10aa   :  { %v1864_v49 = vmul.f32 %v2626_v39, %v1863_v46 }
0x10ac   :  { %v1868_v50 = vsel %vm1867_vm14, %v2626_v39, %v1864_v49 }
0x10ad   :  { %v1870_v52 = vmul.f32 %v1868_v50, %v1836_v18 }
0x10af   :  { %v1875_v53 = vmul.f32 %v2535_v47, %v1870_v52 }
0x10b1   :  { %v1880_v55 = vadd.f32 %v2536_v36, %v1875_v53 }
0x10b3   :  { %v1915_v57 = vpack.c.bf16 %v1880_v55, %v1879_v54 }
0x10b5   :  { %2370 = vmatmul.msk.bf16.vlgmr.msrb.gmra.mxu1 %vm91_vm0, %v1915_v57 }
0x1132   :  { %v1955_v3 = vpop.f32.mrf.mxu1 }
0x1133   :  { %v1956_v4 = vadd.f32 %v2537_v1, %v1955_v3 }
0x1135   :  { %v1960_v5 = vmul.f32 %v1956_v4, %v1956_v4 }
0x1137   :  { %v1962_v17 = vmul.f32 %v1960_v5, %v1956_v4 }
0x1139   :  { %v1964_v24 = vmul.f32 0.044715, %v1962_v17 }
0x113a   :  { %v1957_v14 = vpop.f32.mrf.mxu1 }
0x113b   :  { %v1966_v6 = vadd.f32 %v1964_v24, %v1956_v4  ;;  %v1958_v9 = vadd.f32 %v2537_v1, %v1957_v14 }
0x113d   :  { %v1968_v7 = vmul.f32 0.7978846, %v1966_v6  ;;  %v1961_v11 = vmul.f32 %v1958_v9, %v1958_v9 }
0x113f   :  { %v1963_v12 = vmul.f32 %v1961_v11, %v1958_v9  ;;  %2627 = vtanh.f32 %v1968_v7 }
0x1141   :  { %v1965_v13 = vmul.f32 0.044715, %v1963_v12 }
0x1143   :  { %v1967_v8 = vadd.f32 %v1965_v13, %v1958_v9 }
0x1145   :  { %v1969_v15 = vmul.f32 0.7978846, %v1967_v8  ;;  %v2628_v16 = vpop.eup %2627 }
0x1146   :  { %v1972_v42 = vadd.f32 1.0, %v2628_v16 }
0x1147   :  { %2629 = vtanh.f32 %v1969_v15 }
0x1148   :  { %v1974_v27 = vmul.f32 0.5, %v1972_v42 }
0x114a   :  { %v1976_v20 = vmul.f32 %v1974_v27, %v1956_v4 }
0x114d   :  { %v2630_v56 = vpop.eup %2629 }
0x114e   :  { %v1973_v18 = vadd.f32 1.0, %v2630_v56 }
0x1150   :  { %v1975_v19 = vmul.f32 0.5, %v1973_v18 }
0x1152   :  { %v1977_v28 = vmul.f32 %v1975_v19, %v1958_v9 }
0x1154   :  { %v1978_v21 = vpack.c.bf16 %v1977_v28, %v1976_v20 }
0x1156   :  { %2038 = vmatmul.bf16.vlgmr.msra.gmra.mxu2 %v1978_v21 }
0x11d9   :  { %v2039_v23 = vpop.f32.mrf.mxu2 }
0x11da   :  { %v2040_v25 = vadd.f32 %v2538_v22, %v2039_v23 }
0x11dc   :  { %v2044_v26 = vadd.f32 %v2040_v25, %v1879_v54 }
0x11de   :  { %v2046_v29 = vsel %vm91_vm0, %v2044_v26, 0.0 }
0x11df   :  { %2047 = vadd.xlane.f32.xlu2 %v2046_v29 }
0x11e1   :  { %v2041_v30 = vpop.f32.mrf.mxu2 }
0x11e2   :  { %v2042_v31 = vadd.f32 %v2538_v22, %v2041_v30 }
0x11e4   :  { %v2045_v32 = vadd.f32 %v2042_v31, %v1880_v55 }
0x11e6   :  { %v2049_v33 = vsel %vm91_vm0, %v2045_v32, 0.0 }
0x11e7   :  { %2050 = vadd.xlane.f32.xlu0 %v2049_v33 }
0x1252   :  { %v2048_v34 = vpop.xlane.xlu2 %2047 }
0x1253   :  { %v2052_v35 = vmul.f32 %v2048_v34, %v2831_v10 }
0x1255   :  { %v2054_v37 = vsub.f32 %v2044_v26, %v2052_v35 }
0x1257   :  { %v2056_v38 = vmul.f32 %v2054_v37, %v2054_v37 }
0x1259   :  { %v2058_v39 = vsel %vm91_vm0, %v2056_v38, 0.0 }
0x125a   :  { %v2051_v40 = vpop.xlane.xlu0 %2050  ;;  %2059 = vadd.xlane.f32.xlu1 %v2058_v39 }
0x125b   :  { %v2053_v43 = vmul.f32 %v2051_v40, %v2831_v10 }
0x125d   :  { %v2055_v41 = vsub.f32 %v2045_v32, %v2053_v43 }
0x125f   :  { %v2057_v44 = vmul.f32 %v2055_v41, %v2055_v41 }
0x1261   :  { %v2061_v45 = vsel %vm91_vm0, %v2057_v44, 0.0 }
0x1262   :  { %2062 = vadd.xlane.f32.xlu2 %v2061_v45 }
0x12cd   :  { %v2060_v46 = vpop.xlane.xlu1 %2059 }
0x12ce   :  { %v2064_v47 = vmul.f32 %v2060_v46, %v2831_v10 }
0x12d0   :  { %v2066_v48 = vadd.f32 1e-12, %v2064_v47 }
0x12d2   :  { %2631 = vrsqrt.f32 %v2066_v48  ;;  %vm2074_vm1 = vweird.f32 %v2066_v48 }
0x12d5   :  { %v2063_v49 = vpop.xlane.xlu2 %2062 }
0x12d6   :  { %v2065_v50 = vmul.f32 %v2063_v49, %v2831_v10 }
0x12d8   :  { %v2632_v36 = vpop.eup %2631  ;;  %v2067_v51 = vadd.f32 1e-12, %v2065_v50 }
0x12d9   :  { %v2069_v52 = vmul.f32 %v2632_v36, %v2066_v48  ;;  %vm2075_vm15 = vweird.f32 %v2632_v36 }
0x12da   :  { %2633 = vrsqrt.f32 %v2067_v51  ;;  %vm2076_vm2 = vmor %vm2074_vm1, %vm2075_vm15  ;;  %vm2084_vm4 = vweird.f32 %v2067_v51 }
0x12db   :  { %v2070_v53 = vmul.f32 %v2632_v36, %v2069_v52 }
0x12dd   :  { %v2071_v54 = vmul.f32 0.5, %v2070_v53 }
0x12df   :  { %v2072_v55 = vsub.f32 1.5, %v2071_v54 }
0x12e0   :  { %v2634_v57 = vpop.eup %2633 }
0x12e1   :  { %v2073_v58 = vmul.f32 %v2632_v36, %v2072_v55  ;;  %v2079_v59 = vmul.f32 %v2634_v57, %v2067_v51  ;;  %vm2085_vm3 = vweird.f32 %v2634_v57 }
0x12e2   :  { %vm2086_vm5 = vmor %vm2084_vm4, %vm2085_vm3 }
0x12e3   :  { %v2077_v61 = vsel %vm2076_vm2, %v2632_v36, %v2073_v58  ;;  %v2080_v62 = vmul.f32 %v2634_v57, %v2079_v59 }
0x12e4   :  { %v2088_v10 = vmul.f32 %v2077_v61, %v2054_v37 }
0x12e5   :  { %v2081_v0 = vmul.f32 0.5, %v2080_v62 }
0x12e6   :  { %v2093_v1 = vmul.f32 %v2539_v60, %v2088_v10 }
0x12e7   :  { %v2082_v2 = vsub.f32 1.5, %v2081_v0 }
0x12e8   :  { %v2098_v3 = vadd.f32 %v2540_v63, %v2093_v1 }
0x12e9   :  { %v2083_v4 = vmul.f32 %v2634_v57, %v2082_v2 }
0x12ea   :  { %2100 = vst.msk [vmem:[#allocation7] sm:$0xff] %vm91_vm0, %v2098_v3 }
0x12eb   :  { %v2087_v5 = vsel %vm2086_vm5, %v2634_v57, %v2083_v4 }
0x12ec   :  { %v2089_v17 = vmul.f32 %v2087_v5, %v2055_v41 }
0x12ee   :  { %v2094_v24 = vmul.f32 %v2539_v60, %v2089_v17 }
0x12f0   :  { %v2099_v14 = vadd.f32 %v2540_v63, %v2094_v24 }
0x12f2   :  { %2101 = vst.msk [vmem:[#allocation7 + $0x8] sm:$0xff] %vm91_vm0, %v2099_v14 }
0x12f3   :  { %2114 = dma.vmem_to_hbm [thread:$0]  %s2107_s6, 256, %s2109_s21, [#allocation4], %s2714_s29, %s2714_s29, %s2715_s30  }
0x12f4   :  { %2711 = dma.done.wait [#allocation4], 256  }
0x12f5   :  { %2712 = vsyncadd [#allocation4], 4294967040 }
0x12f6   :  { %2119 = vsyncpa [#allocation3], 1 }
0x12f7   :  { %2120 = vsyncpa [#allocation6], 1 }
0x12f8   :  { %2121 = vsyncpa [#allocation4], 1 }

</bundles_post_ra>
